<compile_context>
chip_gen: v5e
topology: v5e:2x2
jax: 0.10.0
libtpu: 0.0.40
codegen_flags: <defaults>
</compile_context>

<pallas_src>
import functools

import jax
import jax.numpy as jnp
from jax.experimental import pallas as pl
from jax.experimental.pallas import tpu as pltpu

IMAGE_DIM = 28 * 28          # 784 logical input features
HIDDEN = 256
OUT_PAD = 128                # lane-dense padded output width; logical out = 1
LEAKY_SLOPE = 0.01           # PyTorch nn.LeakyReLU default negative_slope


def _round_up(x, m):
    return ((x + m - 1) // m) * m


def _choose_tile_b(B):
    """Batch-tile heuristic.

    x is f32 in HBM, so multiple-of-8 row tiles are layout-dense. For large
    batches, split into >= 2 tiles (keeps both v7x TensorCores busy) and cap the
    tile at 1024 rows (amortizes the ~0.35us per-grid-step overhead while staying
    far below the scoped VMEM limit: ~3.2 MiB x2 for the x tile, ~1 MiB weights).
    """
    b8 = _round_up(max(B, 1), 8)
    if b8 <= 256:
        return b8                                   # single small tile
    half = _round_up((b8 + 1) // 2, 256)            # >= 2 tiles when batch is large
    return max(256, min(1024, half))


def _default_bf16_epilogue():
    # bf16 VALU exists on v6e/v7x; keep the f32 epilogue on v5e and older chips.
    try:
        kind = jax.devices()[0].device_kind.lower()
    except Exception:
        return False
    return ("v6" in kind) or ("v7" in kind)


def discriminator_kernel(x_ref,
                         w1_ref, b1_ref,
                         w2_ref, b2_ref,
                         w3_ref, b3_ref,
                         w4_ref, b4_ref,
                         w5_ref, b5_ref,
                         o_ref, *, bf16_epilogue):
    """5 MXU matmuls (bf16 in, f32 accumulate) + VPU LeakyReLU epilogues, fully fused."""

    def hidden_layer(h_bf16, w_ref, b_ref):
        acc = jnp.dot(h_bf16, w_ref[...], preferred_element_type=jnp.float32) + b_ref[...]
        if bf16_epilogue:
            h = acc.astype(jnp.bfloat16)            # bf16 VALU path (v6e/v7x)
            return jnp.maximum(h, LEAKY_SLOPE * h)  # mul + max (2 ops)
        h = jnp.maximum(acc, LEAKY_SLOPE * acc)     # f32 path (v5e: no bf16 VPU)
        return h.astype(jnp.bfloat16)

    # Cast the raw f32 x tile to bf16 in VMEM (no wrapper-side pad/cast, K=784 direct).
    h = x_ref[...].astype(jnp.bfloat16)
    h = hidden_layer(h, w1_ref, b1_ref)
    h = hidden_layer(h, w2_ref, b2_ref)
    h = hidden_layer(h, w3_ref, b3_ref)
    h = hidden_layer(h, w4_ref, b4_ref)
    logits = jnp.dot(h, w5_ref[...], preferred_element_type=jnp.float32) + b5_ref[...]
    # Store bf16 logits into the lane-dense 128-wide output; sigmoid runs in f32 in the wrapper.
    o_ref[...] = logits.astype(jnp.bfloat16)


def init_params(key):
    """Deterministic init mimicking PyTorch nn.Linear (uniform +-1/sqrt(fan_in)).

    Weights stored as (in_features, out_features) f32; biases as (1, out_features).
    """
    dims = [(IMAGE_DIM, HIDDEN), (HIDDEN, HIDDEN), (HIDDEN, HIDDEN),
            (HIDDEN, HIDDEN), (HIDDEN, 1)]
    params = []
    for (fan_in, fan_out) in dims:
        key, kw, kb = jax.random.split(key, 3)
        bound = 1.0 / (fan_in ** 0.5)
        w = jax.random.uniform(kw, (fan_in, fan_out), jnp.float32, -bound, bound)
        b = jax.random.uniform(kb, (1, fan_out), jnp.float32, -bound, bound)
        params.extend([w, b])
    return params


def pack_params(params):
    """Cast weights to bf16; pad only the last layer's 1-wide output to 128 lanes."""
    w1, b1, w2, b2, w3, b3, w4, b4, w5, b5 = params
    w5p = jnp.zeros((HIDDEN, OUT_PAD), jnp.bfloat16).at[:, :1].set(w5.astype(jnp.bfloat16))
    b5p = jnp.zeros((1, OUT_PAD), jnp.float32).at[:, :1].set(b5)
    return [
        w1.astype(jnp.bfloat16), b1,
        w2.astype(jnp.bfloat16), b2,
        w3.astype(jnp.bfloat16), b3,
        w4.astype(jnp.bfloat16), b4,
        w5p, b5p,
    ]


@functools.partial(jax.jit, static_argnames=("tile_b", "bf16_epilogue"))
def discriminator_forward(x, kernel_params, tile_b=None, bf16_epilogue=True):
    """x: (B, 784) f32/bf16.  kernel_params: output of pack_params().  Returns (B, 1) f32."""
    B = x.shape[0]
    if tile_b is None:
        tile_b = _choose_tile_b(B)
    grid = (pl.cdiv(B, tile_b),)

    # x: tiled over batch rows; 784 == full last dim so no K padding is needed.
    in_specs = [pl.BlockSpec((tile_b, IMAGE_DIM), lambda i: (i, 0))]
    # Weights/biases: full block, constant index_map -> DMA'd once, VMEM-resident.
    for p in kernel_params:
        in_specs.append(pl.BlockSpec(p.shape, lambda i: (0, 0)))

    kernel = functools.partial(discriminator_kernel, bf16_epilogue=bf16_epilogue)

    logits = pl.pallas_call(
        kernel,
        out_shape=jax.ShapeDtypeStruct((B, OUT_PAD), jnp.bfloat16),
        grid=grid,
        in_specs=in_specs,
        out_specs=pl.BlockSpec((tile_b, OUT_PAD), lambda i: (i, 0)),
        compiler_params=pltpu.CompilerParams(
            dimension_semantics=("parallel",),   # batch tiles shard across v7x's 2 TCs
        ),
    )(x, *kernel_params)

    # Slice the single meaningful column; sigmoid in f32 (XLA fuses it with the slice).
    return jax.nn.sigmoid(logits[:, :1].astype(jnp.float32))


def reference_forward(x, params, bf16_epilogue=True):
    """Pure-JAX reference mirroring the kernel's numerics (bf16 MXU inputs, f32 accum)."""
    ws, bs = params[0::2], params[1::2]
    h = x.astype(jnp.bfloat16)
    for w, b in zip(ws[:-1], bs[:-1]):
        acc = jnp.dot(h, w.astype(jnp.bfloat16), preferred_element_type=jnp.float32) + b
        if bf16_epilogue:
            hb = acc.astype(jnp.bfloat16)
            h = jnp.maximum(hb, LEAKY_SLOPE * hb)
        else:
            h = jnp.maximum(acc, LEAKY_SLOPE * acc).astype(jnp.bfloat16)
    logits = jnp.dot(h, ws[-1].astype(jnp.bfloat16), preferred_element_type=jnp.float32) + bs[-1]
    logits = logits.astype(jnp.bfloat16).astype(jnp.float32)
    return jax.nn.sigmoid(logits)


def reference_forward_f32(x, params):
    """Full-f32 reference (matches the original PyTorch module up to bf16 precision)."""
    ws, bs = params[0::2], params[1::2]
    h = x
    for idx, (w, b) in enumerate(zip(ws, bs)):
        h = h @ w + b
        if idx < len(ws) - 1:
            h = jnp.where(h > 0, h, LEAKY_SLOPE * h)
    return jax.nn.sigmoid(h)


if __name__ == "__main__":
    key = jax.random.PRNGKey(0)
    key, kx = jax.random.split(key)
    B = 8
    x = jax.random.normal(kx, (B, IMAGE_DIM), jnp.float32)

    params = init_params(key)              # logical f32 params (PyTorch layout semantics)
    kernel_params = pack_params(params)    # bf16 weights / f32 biases for the kernel
    bf16_epi = _default_bf16_epilogue()    # bf16 epilogue only where the VALU supports it

    out = discriminator_forward(x, kernel_params, bf16_epilogue=bf16_epi)
    out = jax.block_until_ready(out)

    ref = reference_forward(x, params, bf16_epi)    # mirrors kernel precision
    ref_f32 = reference_forward_f32(x, params)      # pure f32 module semantics

    assert out.shape == (B, 1)
    assert bool(jnp.all(jnp.isfinite(out)))
    err_bf16 = float(jnp.max(jnp.abs(out - ref)))
    err_f32 = float(jnp.max(jnp.abs(out - ref_f32)))
    assert err_bf16 < 5e-3, "max abs diff vs bf16-mirror reference: %g" % err_bf16
    assert err_f32 < 5e-2, "max abs diff vs f32 reference: %g" % err_f32
    print("KERNEL_OK")
</pallas_src>

<mosaic_0001>
module attributes {stable_mosaic.version = 11 : i64} {
  func.func @discriminator_kernel(%arg0: i32, %arg1: memref<8x784xf32, #tpu.memory_space<vmem>>, %arg2: memref<784x256xbf16, #tpu.memory_space<vmem>>, %arg3: memref<1x256xf32, #tpu.memory_space<vmem>>, %arg4: memref<256x256xbf16, #tpu.memory_space<vmem>>, %arg5: memref<1x256xf32, #tpu.memory_space<vmem>>, %arg6: memref<256x256xbf16, #tpu.memory_space<vmem>>, %arg7: memref<1x256xf32, #tpu.memory_space<vmem>>, %arg8: memref<256x256xbf16, #tpu.memory_space<vmem>>, %arg9: memref<1x256xf32, #tpu.memory_space<vmem>>, %arg10: memref<256x128xbf16, #tpu.memory_space<vmem>>, %arg11: memref<1x128xf32, #tpu.memory_space<vmem>>, %arg12: memref<8x128xbf16, #tpu.memory_space<vmem>>) attributes {dimension_semantics = [#tpu.dimension_semantics<parallel>], iteration_bounds = array<i64: 1>, scalar_prefetch = 0 : i64, scratch_operands = 0 : i64, tpu.core_type = #tpu.core_type<tc>, window_params = [{transform_indices = @transform_0, window_bounds = array<i64: 8, 784>}, {pipeline_mode = #tpu.pipeline_mode<synchronous>, transform_indices = @transform_1, window_bounds = array<i64: 784, 256>}, {pipeline_mode = #tpu.pipeline_mode<synchronous>, transform_indices = @transform_2, window_bounds = array<i64: 1, 256>}, {pipeline_mode = #tpu.pipeline_mode<synchronous>, transform_indices = @transform_3, window_bounds = array<i64: 256, 256>}, {pipeline_mode = #tpu.pipeline_mode<synchronous>, transform_indices = @transform_4, window_bounds = array<i64: 1, 256>}, {pipeline_mode = #tpu.pipeline_mode<synchronous>, transform_indices = @transform_5, window_bounds = array<i64: 256, 256>}, {pipeline_mode = #tpu.pipeline_mode<synchronous>, transform_indices = @transform_6, window_bounds = array<i64: 1, 256>}, {pipeline_mode = #tpu.pipeline_mode<synchronous>, transform_indices = @transform_7, window_bounds = array<i64: 256, 256>}, {pipeline_mode = #tpu.pipeline_mode<synchronous>, transform_indices = @transform_8, window_bounds = array<i64: 1, 256>}, {pipeline_mode = #tpu.pipeline_mode<synchronous>, transform_indices = @transform_9, window_bounds = array<i64: 256, 128>}, {pipeline_mode = #tpu.pipeline_mode<synchronous>, transform_indices = @transform_10, window_bounds = array<i64: 1, 128>}, {transform_indices = @transform_11, window_bounds = array<i64: 8, 128>}]} {
    %c0 = arith.constant 0 : index
    %c0_0 = arith.constant 0 : index
    %0 = vector.load %arg1[%c0, %c0_0] : memref<8x784xf32, #tpu.memory_space<vmem>>, vector<8x784xf32>
    %1 = arith.truncf %0 : vector<8x784xf32> to vector<8x784xbf16>
    %c0_1 = arith.constant 0 : index
    %c0_2 = arith.constant 0 : index
    %2 = vector.load %arg2[%c0_1, %c0_2] : memref<784x256xbf16, #tpu.memory_space<vmem>>, vector<784x256xbf16>
    %cst = arith.constant dense<0.000000e+00> : vector<8x256xf32>
    %3 = tpu.matmul %1, %2, %cst {dimension_numbers = #tpu.dot_dimension_numbers<[1], [0], [0], [1], [0, 0, 1, 1], [], []>} : vector<8x784xbf16>, vector<784x256xbf16>, vector<8x256xf32> -> vector<8x256xf32>
    %c0_3 = arith.constant 0 : index
    %c0_4 = arith.constant 0 : index
    %4 = vector.load %arg3[%c0_3, %c0_4] : memref<1x256xf32, #tpu.memory_space<vmem>>, vector<1x256xf32>
    %5 = vector.broadcast %4 : vector<1x256xf32> to vector<8x256xf32>
    %6 = arith.addf %3, %5 : vector<8x256xf32>
    %cst_5 = arith.constant 0.00999999977 : f32
    %7 = vector.broadcast %cst_5 : f32 to vector<8x256xf32>
    %8 = arith.mulf %7, %6 : vector<8x256xf32>
    %9 = arith.maximumf %6, %8 : vector<8x256xf32>
    %10 = arith.truncf %9 : vector<8x256xf32> to vector<8x256xbf16>
    %c0_6 = arith.constant 0 : index
    %c0_7 = arith.constant 0 : index
    %11 = vector.load %arg4[%c0_6, %c0_7] : memref<256x256xbf16, #tpu.memory_space<vmem>>, vector<256x256xbf16>
    %cst_8 = arith.constant dense<0.000000e+00> : vector<8x256xf32>
    %12 = tpu.matmul %10, %11, %cst_8 {dimension_numbers = #tpu.dot_dimension_numbers<[1], [0], [0], [1], [0, 0, 1, 1], [], []>} : vector<8x256xbf16>, vector<256x256xbf16>, vector<8x256xf32> -> vector<8x256xf32>
    %c0_9 = arith.constant 0 : index
    %c0_10 = arith.constant 0 : index
    %13 = vector.load %arg5[%c0_9, %c0_10] : memref<1x256xf32, #tpu.memory_space<vmem>>, vector<1x256xf32>
    %14 = vector.broadcast %13 : vector<1x256xf32> to vector<8x256xf32>
    %15 = arith.addf %12, %14 : vector<8x256xf32>
    %cst_11 = arith.constant 0.00999999977 : f32
    %16 = vector.broadcast %cst_11 : f32 to vector<8x256xf32>
    %17 = arith.mulf %16, %15 : vector<8x256xf32>
    %18 = arith.maximumf %15, %17 : vector<8x256xf32>
    %19 = arith.truncf %18 : vector<8x256xf32> to vector<8x256xbf16>
    %c0_12 = arith.constant 0 : index
    %c0_13 = arith.constant 0 : index
    %20 = vector.load %arg6[%c0_12, %c0_13] : memref<256x256xbf16, #tpu.memory_space<vmem>>, vector<256x256xbf16>
    %cst_14 = arith.constant dense<0.000000e+00> : vector<8x256xf32>
    %21 = tpu.matmul %19, %20, %cst_14 {dimension_numbers = #tpu.dot_dimension_numbers<[1], [0], [0], [1], [0, 0, 1, 1], [], []>} : vector<8x256xbf16>, vector<256x256xbf16>, vector<8x256xf32> -> vector<8x256xf32>
    %c0_15 = arith.constant 0 : index
    %c0_16 = arith.constant 0 : index
    %22 = vector.load %arg7[%c0_15, %c0_16] : memref<1x256xf32, #tpu.memory_space<vmem>>, vector<1x256xf32>
    %23 = vector.broadcast %22 : vector<1x256xf32> to vector<8x256xf32>
    %24 = arith.addf %21, %23 : vector<8x256xf32>
    %cst_17 = arith.constant 0.00999999977 : f32
    %25 = vector.broadcast %cst_17 : f32 to vector<8x256xf32>
    %26 = arith.mulf %25, %24 : vector<8x256xf32>
    %27 = arith.maximumf %24, %26 : vector<8x256xf32>
    %28 = arith.truncf %27 : vector<8x256xf32> to vector<8x256xbf16>
    %c0_18 = arith.constant 0 : index
    %c0_19 = arith.constant 0 : index
    %29 = vector.load %arg8[%c0_18, %c0_19] : memref<256x256xbf16, #tpu.memory_space<vmem>>, vector<256x256xbf16>
    %cst_20 = arith.constant dense<0.000000e+00> : vector<8x256xf32>
    %30 = tpu.matmul %28, %29, %cst_20 {dimension_numbers = #tpu.dot_dimension_numbers<[1], [0], [0], [1], [0, 0, 1, 1], [], []>} : vector<8x256xbf16>, vector<256x256xbf16>, vector<8x256xf32> -> vector<8x256xf32>
    %c0_21 = arith.constant 0 : index
    %c0_22 = arith.constant 0 : index
    %31 = vector.load %arg9[%c0_21, %c0_22] : memref<1x256xf32, #tpu.memory_space<vmem>>, vector<1x256xf32>
    %32 = vector.broadcast %31 : vector<1x256xf32> to vector<8x256xf32>
    %33 = arith.addf %30, %32 : vector<8x256xf32>
    %cst_23 = arith.constant 0.00999999977 : f32
    %34 = vector.broadcast %cst_23 : f32 to vector<8x256xf32>
    %35 = arith.mulf %34, %33 : vector<8x256xf32>
    %36 = arith.maximumf %33, %35 : vector<8x256xf32>
    %37 = arith.truncf %36 : vector<8x256xf32> to vector<8x256xbf16>
    %c0_24 = arith.constant 0 : index
    %c0_25 = arith.constant 0 : index
    %38 = vector.load %arg10[%c0_24, %c0_25] : memref<256x128xbf16, #tpu.memory_space<vmem>>, vector<256x128xbf16>
    %cst_26 = arith.constant dense<0.000000e+00> : vector<8x128xf32>
    %39 = tpu.matmul %37, %38, %cst_26 {dimension_numbers = #tpu.dot_dimension_numbers<[1], [0], [0], [1], [0, 0, 1, 1], [], []>} : vector<8x256xbf16>, vector<256x128xbf16>, vector<8x128xf32> -> vector<8x128xf32>
    %c0_27 = arith.constant 0 : index
    %c0_28 = arith.constant 0 : index
    %40 = vector.load %arg11[%c0_27, %c0_28] : memref<1x128xf32, #tpu.memory_space<vmem>>, vector<1x128xf32>
    %41 = vector.broadcast %40 : vector<1x128xf32> to vector<8x128xf32>
    %42 = arith.addf %39, %41 : vector<8x128xf32>
    %43 = arith.truncf %42 : vector<8x128xf32> to vector<8x128xbf16>
    %c0_29 = arith.constant 0 : index
    %c0_30 = arith.constant 0 : index
    %44 = vector.load %arg12[%c0_29, %c0_30] : memref<8x128xbf16, #tpu.memory_space<vmem>>, vector<8x128xbf16>
    tpu.vector_store %arg12[%c0_29, %c0_30], %43 {strides = array<i32>} : memref<8x128xbf16, #tpu.memory_space<vmem>>, vector<8x128xbf16>,
    return
  }
  func.func @transform_0(%arg0: i32) -> (i32, i32) {
    %c0_i32 = arith.constant 0 : i32
    %c0_i32_0 = arith.constant 0 : i32
    return %arg0, %c0_i32 : i32, i32
  }
  func.func @transform_1(%arg0: i32) -> (i32, i32) {
    %c0_i32 = arith.constant 0 : i32
    %c0_i32_0 = arith.constant 0 : i32
    %c0_i32_1 = arith.constant 0 : i32
    return %c0_i32, %c0_i32_0 : i32, i32
  }
  func.func @transform_2(%arg0: i32) -> (i32, i32) {
    %c0_i32 = arith.constant 0 : i32
    %c0_i32_0 = arith.constant 0 : i32
    %c0_i32_1 = arith.constant 0 : i32
    return %c0_i32, %c0_i32_0 : i32, i32
  }
  func.func @transform_3(%arg0: i32) -> (i32, i32) {
    %c0_i32 = arith.constant 0 : i32
    %c0_i32_0 = arith.constant 0 : i32
    %c0_i32_1 = arith.constant 0 : i32
    return %c0_i32, %c0_i32_0 : i32, i32
  }
  func.func @transform_4(%arg0: i32) -> (i32, i32) {
    %c0_i32 = arith.constant 0 : i32
    %c0_i32_0 = arith.constant 0 : i32
    %c0_i32_1 = arith.constant 0 : i32
    return %c0_i32, %c0_i32_0 : i32, i32
  }
  func.func @transform_5(%arg0: i32) -> (i32, i32) {
    %c0_i32 = arith.constant 0 : i32
    %c0_i32_0 = arith.constant 0 : i32
    %c0_i32_1 = arith.constant 0 : i32
    return %c0_i32, %c0_i32_0 : i32, i32
  }
  func.func @transform_6(%arg0: i32) -> (i32, i32) {
    %c0_i32 = arith.constant 0 : i32
    %c0_i32_0 = arith.constant 0 : i32
    %c0_i32_1 = arith.constant 0 : i32
    return %c0_i32, %c0_i32_0 : i32, i32
  }
  func.func @transform_7(%arg0: i32) -> (i32, i32) {
    %c0_i32 = arith.constant 0 : i32
    %c0_i32_0 = arith.constant 0 : i32
    %c0_i32_1 = arith.constant 0 : i32
    return %c0_i32, %c0_i32_0 : i32, i32
  }
  func.func @transform_8(%arg0: i32) -> (i32, i32) {
    %c0_i32 = arith.constant 0 : i32
    %c0_i32_0 = arith.constant 0 : i32
    %c0_i32_1 = arith.constant 0 : i32
    return %c0_i32, %c0_i32_0 : i32, i32
  }
  func.func @transform_9(%arg0: i32) -> (i32, i32) {
    %c0_i32 = arith.constant 0 : i32
    %c0_i32_0 = arith.constant 0 : i32
    %c0_i32_1 = arith.constant 0 : i32
    return %c0_i32, %c0_i32_0 : i32, i32
  }
  func.func @transform_10(%arg0: i32) -> (i32, i32) {
    %c0_i32 = arith.constant 0 : i32
    %c0_i32_0 = arith.constant 0 : i32
    %c0_i32_1 = arith.constant 0 : i32
    return %c0_i32, %c0_i32_0 : i32, i32
  }
  func.func @transform_11(%arg0: i32) -> (i32, i32) {
    %c0_i32 = arith.constant 0 : i32
    %c0_i32_0 = arith.constant 0 : i32
    return %arg0, %c0_i32 : i32, i32
  }
}

</mosaic_0001>

<bundles_post_ra>
// kernel: discriminator_forward.1
= control target key start
LH: loop header
LB: loop body
LE: loop exit
PB: predicated region body
PF: predicated region fallthrough
CT: control target
= control target key end

     0   :  { %16 = vsyncpa [#allocation3], 0  ;;  %s3279_s0 = inlined_call_operand.hbm [shape: f32[8,784], index: 0, kind: input, shape index: {}]   ;;  %s3280_s1 = inlined_call_operand.hbm [shape: bf16[784,256], index: 1, kind: input, shape index: {}]   ;;  %s3281_s2 = inlined_call_operand.hbm [shape: f32[1,256], index: 2, kind: input, shape index: {}]   ;;  %s3282_s3 = inlined_call_operand.hbm [shape: bf16[256,256], index: 3, kind: input, shape index: {}]   ;;  %s3283_s4 = inlined_call_operand.vmem [shape: f32[1,256], index: 4, kind: input, shape index: {}]   ;;  %s3284_s5 = inlined_call_operand.hbm [shape: bf16[256,256], index: 5, kind: input, shape index: {}]   ;;  %s3285_s6 = inlined_call_operand.vmem [shape: f32[1,256], index: 6, kind: input, shape index: {}]   ;;  %s3286_s7 = inlined_call_operand.hbm [shape: bf16[256,256], index: 7, kind: input, shape index: {}]   ;;  %s3287_s8 = inlined_call_operand.vmem [shape: f32[1,256], index: 8, kind: input, shape index: {}]   ;;  %s3288_s9 = inlined_call_operand.hbm [shape: bf16[256,128], index: 9, kind: input, shape index: {}]   ;;  %s3289_s10 = inlined_call_operand.vmem [shape: f32[1,128], index: 10, kind: input, shape index: {}]   ;;  %s3290_s11 = inlined_call_operand.vmem [shape: bf16[8,128], index: 11, kind: output, shape index: {}]  }
   0x1   :  { %17 = vsyncpa [#allocation5], 0 }
   0x2   :  { %18 = vsyncpa [#allocation8], 0  ;;  %s35_s19 = sshll.u32 %s3280_s1, 4  ;;  %s36_s19 = int_to_ptr.hbm [resolvable:$true] %s35_s19 }
   0x3   :  { %19 = vsyncpa [#allocation11], 0  ;;  %s3120_s20 = smov [#allocation4]   ;;  %s59_s24 = sshll.u32 %s3282_s3, 4  ;;  %s60_s24 = int_to_ptr.hbm [resolvable:$true] %s59_s24 }
   0x4   :  { %s37_s21 = sshll.u32 %s3120_s20, 4  ;;  %s3121_s25 = smov 128   ;;  %s38_s21 = int_to_ptr.vmem [resolvable:$true] %s37_s21 }
   0x5   :  { %s3122_s26 = smov 8   ;;  %s3123_s27 = smov [#allocation7]  }
   0x6   :  { %43 = dma.hbm_to_vmem [thread:$0]  %s36_s19, 12544, %s38_s21, [#allocation5], %s3121_s25, %s3121_s25, %s3122_s26  }
   0x7   :  { %s61_s28 = sshll.u32 %s3123_s27, 4  ;;  %s89_s30 = sshll.u32 %s3286_s7, 4  ;;  %s62_s28 = int_to_ptr.vmem [resolvable:$true] %s61_s28  ;;  %s90_s30 = int_to_ptr.hbm [resolvable:$true] %s89_s30 }
   0x8   :  { %67 = dma.hbm_to_vmem [thread:$0]  %s60_s24, 4096, %s62_s28, [#allocation8], %s3121_s25, %s3121_s25, %s3122_s26  }
   0x9   :  { %s25_s13 = sshll.u32 %s3279_s0, 4  ;;  %s3124_s14 = smov [#allocation10]   ;;  %s26_s13 = int_to_ptr.hbm [resolvable:$true] %s25_s13 }
   0xa   :  { %s91_s15 = sshll.u32 %s3124_s14, 4  ;;  %s3125_s16 = smov [#allocation2]   ;;  %s92_s15 = int_to_ptr.vmem [resolvable:$true] %s91_s15 }
   0xb   :  { %97 = dma.hbm_to_vmem [thread:$0]  %s90_s30, 4096, %s92_s15, [#allocation11], %s3121_s25, %s3121_s25, %s3122_s26  }
   0xc   :  { %s27_s7 = sshll.u32 %s3125_s16, 4  ;;  %s49_s19 = sshll.u32 %s3281_s2, 4  ;;  %s28_s7 = int_to_ptr.vmem [resolvable:$true] %s27_s7  ;;  %s50_s19 = int_to_ptr.hbm [resolvable:$true] %s49_s19 }
   0xd   :  { %30 = dma.hbm_to_vmem [thread:$0]  %s26_s13, 896, %s28_s7, [#allocation3]  }
   0xe   :  { %s74_s0 = sshll.u32 %s3284_s5, 4  ;;  %s3126_s22 = smov [#allocation6]   ;;  %s75_s0 = int_to_ptr.hbm [resolvable:$true] %s74_s0 }
   0xf   :  { %s51_s23 = sshll.u32 %s3126_s22, 4  ;;  %s3127_s24 = smov [#allocation9]   ;;  %s52_s23 = int_to_ptr.vmem [resolvable:$true] %s51_s23 }
  0x10   :  { %54 = dma.hbm_to_vmem [thread:$0]  %s50_s19, 32, %s52_s23, [#allocation5]  }
  0x11   :  { %s76_s27 = sshll.u32 %s3127_s24, 4  ;;  %s104_s1 = sshll.u32 %s3288_s9, 4  ;;  %s77_s27 = int_to_ptr.vmem [resolvable:$true] %s76_s27  ;;  %s105_s1 = int_to_ptr.hbm [resolvable:$true] %s104_s1 }
  0x12   :  { %82 = dma.hbm_to_vmem [thread:$0]  %s75_s0, 4096, %s77_s27, [#allocation8], %s3121_s25, %s3121_s25, %s3122_s26  }
  0x13   :  { %s3128_s2 = smov [#allocation12]   ;;  %s3129_s5 = smov 64  }
  0x14   :  { %s106_s30 = sshll.u32 %s3128_s2, 4  ;;  %s3130_s3 = smov 4   ;;  %s107_s30 = int_to_ptr.vmem [resolvable:$true] %s106_s30 }
  0x15   :  { %112 = dma.hbm_to_vmem [thread:$0]  %s105_s1, 2048, %s107_s30, [#allocation11], %s3129_s5, %s3129_s5, %s3130_s3  }
  0x16   :  { %3112 = dma.done.wait [#allocation3], 896  }
  0x17   :  { %3113 = vsyncadd [#allocation3], 4294966400 }
  0x18   :  { %3114 = dma.done.wait [#allocation5], 12576  }
  0x19   :  { %3115 = vsyncadd [#allocation5], 4294954720 }
  0x1a   :  { %3116 = dma.done.wait [#allocation8], 8192  }
  0x1b   :  { %3117 = vsyncadd [#allocation8], 4294959104 }
  0x1c   :  { %3118 = dma.done.wait [#allocation11], 6144  }
  0x1d   :  { %3119 = vsyncadd [#allocation11], 4294961152  ;;  %v1938_v0 = vld [vmem:[#allocation4 + $0x70] sm:$0xf]  ;;  %v2737_v1 = vld [vmem:[#allocation4 + $0x74] sm:$0xf0] }
  0x1e   :  { %v2066_v2 = vld [vmem:[#allocation4 + $0x170] sm:$0xf]  ;;  %v1939_v3 = vor.u32 %v2737_v1, %v1938_v0  ;;  %v2769_v4 = vld [vmem:[#allocation4 + $0x174] sm:$0xf0]  ;;  %v1930_v11 = vld [vmem:[#allocation4 + $0x60] sm:$0xf] }
  0x1f   :  { %v2130_v5 = vld [vmem:[#allocation4 + $0x1f0] sm:$0xf]  ;;  %v2785_v6 = vld [vmem:[#allocation4 + $0x1f4] sm:$0xf0]  ;;  %v2067_v7 = vor.u32 %v2769_v4, %v2066_v2  ;;  %v2735_v13 = vld [vmem:[#allocation4 + $0x64] sm:$0xf0] }
  0x20   :  { %v2131_v8 = vor.u32 %v2785_v6, %v2130_v5  ;;  %v2002_v9 = vld [vmem:[#allocation4 + $0xf0] sm:$0xf]  ;;  %v2753_v10 = vld [vmem:[#allocation4 + $0xf4] sm:$0xf0]  ;;  %756 = vmatpush.bf16.msra.mxu0 %v1939_v3  ;;  %v2058_v14 = vld [vmem:[#allocation4 + $0x160] sm:$0xf]  ;;  %v1931_v16 = vor.u32 %v2735_v13, %v1930_v11 }
  0x21   :  { %v2003_v12 = vor.u32 %v2753_v10, %v2002_v9  ;;  %v2767_v15 = vld [vmem:[#allocation4 + $0x164] sm:$0xf0]  ;;  %782 = vmatpush.bf16.msra.mxu2 %v2067_v7  ;;  %v2122_v18 = vld [vmem:[#allocation4 + $0x1e0] sm:$0xf]  ;;  %v1922_v23 = vld [vmem:[#allocation4 + $0x50] sm:$0xf] }
  0x22   :  { %795 = vmatpush.bf16.msra.mxu3 %v2131_v8  ;;  %v2059_v17 = vor.u32 %v2767_v15, %v2058_v14  ;;  %v2783_v19 = vld [vmem:[#allocation4 + $0x1e4] sm:$0xf0]  ;;  %v1994_v20 = vld [vmem:[#allocation4 + $0xe0] sm:$0xf]  ;;  %v2733_v24 = vld [vmem:[#allocation4 + $0x54] sm:$0xf0] }
  0x23   :  { %769 = vmatpush.bf16.msra.mxu1 %v2003_v12  ;;  %v2123_v21 = vor.u32 %v2783_v19, %v2122_v18  ;;  %v2751_v22 = vld [vmem:[#allocation4 + $0xe4] sm:$0xf0]  ;;  %v2050_v26 = vld [vmem:[#allocation4 + $0x150] sm:$0xf]  ;;  %v2765_v27 = vld [vmem:[#allocation4 + $0x154] sm:$0xf0]  ;;  %v1923_v29 = vor.u32 %v2733_v24, %v1922_v23 }
  0x24   :  { %v1995_v25 = vor.u32 %v2751_v22, %v1994_v20  ;;  %v2114_v28 = vld [vmem:[#allocation4 + $0x1d0] sm:$0xf]  ;;  %757 = vmatpush.bf16.msra.mxu0 %v1931_v16  ;;  %v2781_v30 = vld [vmem:[#allocation4 + $0x1d4] sm:$0xf0]  ;;  %v2051_v33 = vor.u32 %v2765_v27, %v2050_v26  ;;  %v1914_v35 = vld [vmem:[#allocation4 + $0x40] sm:$0xf] }
  0x25   :  { %v1986_v31 = vld [vmem:[#allocation4 + $0xd0] sm:$0xf]  ;;  %v2749_v32 = vld [vmem:[#allocation4 + $0xd4] sm:$0xf0]  ;;  %783 = vmatpush.bf16.msra.mxu2 %v2059_v17  ;;  %v2115_v34 = vor.u32 %v2781_v30, %v2114_v28  ;;  %v2731_v36 = vld [vmem:[#allocation4 + $0x44] sm:$0xf0] }
  0x26   :  { %796 = vmatpush.bf16.msra.mxu3 %v2123_v21  ;;  %v2042_v37 = vld [vmem:[#allocation4 + $0x140] sm:$0xf]  ;;  %v1987_v38 = vor.u32 %v2749_v32, %v1986_v31  ;;  %v2763_v39 = vld [vmem:[#allocation4 + $0x144] sm:$0xf0]  ;;  %v1915_v44 = vor.u32 %v2731_v36, %v1914_v35  ;;  %v1906_v47 = vld [vmem:[#allocation4 + $0x30] sm:$0xf] }
  0x27   :  { %770 = vmatpush.bf16.msra.mxu1 %v1995_v25  ;;  %v2106_v40 = vld [vmem:[#allocation4 + $0x1c0] sm:$0xf]  ;;  %v2779_v41 = vld [vmem:[#allocation4 + $0x1c4] sm:$0xf0]  ;;  %v2043_v45 = vor.u32 %v2763_v39, %v2042_v37  ;;  %v2729_v48 = vld [vmem:[#allocation4 + $0x34] sm:$0xf0] }
  0x28   :  { %v1978_v42 = vld [vmem:[#allocation4 + $0xc0] sm:$0xf]  ;;  %v2747_v43 = vld [vmem:[#allocation4 + $0xc4] sm:$0xf0]  ;;  %758 = vmatpush.bf16.msra.mxu0 %v1923_v29  ;;  %v2107_v46 = vor.u32 %v2779_v41, %v2106_v40  ;;  %v2034_v49 = vld [vmem:[#allocation4 + $0x130] sm:$0xf]  ;;  %v1907_v56 = vor.u32 %v2729_v48, %v1906_v47 }
  0x29   :  { %784 = vmatpush.bf16.msra.mxu2 %v2051_v33  ;;  %v1979_v50 = vor.u32 %v2747_v43, %v1978_v42  ;;  %v2761_v51 = vld [vmem:[#allocation4 + $0x134] sm:$0xf0]  ;;  %v2098_v52 = vld [vmem:[#allocation4 + $0x1b0] sm:$0xf]  ;;  %v1898_v59 = vld [vmem:[#allocation4 + $0x20] sm:$0xf] }
  0x2a   :  { %797 = vmatpush.bf16.msra.mxu3 %v2115_v34  ;;  %v2777_v53 = vld [vmem:[#allocation4 + $0x1b4] sm:$0xf0]  ;;  %v1970_v54 = vld [vmem:[#allocation4 + $0xb0] sm:$0xf]  ;;  %v2035_v57 = vor.u32 %v2761_v51, %v2034_v49  ;;  %v2727_v60 = vld [vmem:[#allocation4 + $0x24] sm:$0xf0] }
  0x2b   :  { %771 = vmatpush.bf16.msra.mxu1 %v1987_v38  ;;  %v2745_v55 = vld [vmem:[#allocation4 + $0xb4] sm:$0xf0]  ;;  %v2099_v58 = vor.u32 %v2777_v53, %v2098_v52  ;;  %v2026_v61 = vld [vmem:[#allocation4 + $0x120] sm:$0xf]  ;;  %v2759_v63 = vld [vmem:[#allocation4 + $0x124] sm:$0xf0]  ;;  %v1899_v4 = vor.u32 %v2727_v60, %v1898_v59 }
  0x2c   :  { %759 = vmatpush.bf16.msra.mxu0 %v1915_v44  ;;  %v1971_v62 = vor.u32 %v2745_v55, %v1970_v54  ;;  %v2090_v0 = vld [vmem:[#allocation4 + $0x1a0] sm:$0xf]  ;;  %v2775_v1 = vld [vmem:[#allocation4 + $0x1a4] sm:$0xf0]  ;;  %v2027_v5 = vor.u32 %v2759_v63, %v2026_v61  ;;  %v1890_v7 = vld [vmem:[#allocation4 + $0x10] sm:$0xf] }
  0x2d   :  { %785 = vmatpush.bf16.msra.mxu2 %v2043_v45  ;;  %v1962_v2 = vld [vmem:[#allocation4 + $0xa0] sm:$0xf]  ;;  %v2743_v3 = vld [vmem:[#allocation4 + $0xa4] sm:$0xf0]  ;;  %v2091_v6 = vor.u32 %v2775_v1, %v2090_v0  ;;  %v2725_v8 = vld [vmem:[#allocation4 + $0x14] sm:$0xf0] }
  0x2e   :  { %798 = vmatpush.bf16.msra.mxu3 %v2107_v46  ;;  %v2018_v9 = vld [vmem:[#allocation4 + $0x110] sm:$0xf]  ;;  %v1963_v10 = vor.u32 %v2743_v3, %v1962_v2  ;;  %v2757_v11 = vld [vmem:[#allocation4 + $0x114] sm:$0xf0]  ;;  %v1891_v16 = vor.u32 %v2725_v8, %v1890_v7  ;;  %v1882_v17 = vld [vmem:[#allocation4] sm:$0xf] }
  0x2f   :  { %772 = vmatpush.bf16.msra.mxu1 %v1979_v50  ;;  %v2082_v12 = vld [vmem:[#allocation4 + $0x190] sm:$0xf]  ;;  %v2773_v13 = vld [vmem:[#allocation4 + $0x194] sm:$0xf0]  ;;  %v2723_v18 = vld [vmem:[#allocation4 + $0x4] sm:$0xf0]  ;;  %v2019_v20 = vor.u32 %v2757_v11, %v2018_v9 }
  0x30   :  { %760 = vmatpush.bf16.msra.mxu0 %v1907_v56  ;;  %v1954_v14 = vld [vmem:[#allocation4 + $0x90] sm:$0xf]  ;;  %v2741_v15 = vld [vmem:[#allocation4 + $0x94] sm:$0xf0]  ;;  %v2010_v19 = vld [vmem:[#allocation4 + $0x100] sm:$0xf]  ;;  %v2083_v21 = vor.u32 %v2773_v13, %v2082_v12  ;;  %v1883_v32 = vor.u32 %v2723_v18, %v1882_v17 }
  0x31   :  { %786 = vmatpush.bf16.msra.mxu2 %v2035_v57  ;;  %v2755_v22 = vld [vmem:[#allocation4 + $0x104] sm:$0xf0]  ;;  %v2074_v23 = vld [vmem:[#allocation4 + $0x180] sm:$0xf]  ;;  %v1955_v25 = vor.u32 %v2741_v15, %v1954_v14  ;;  %v2194_v26 = vld [vmem:[#allocation4 + $0x270] sm:$0xf] }
  0x32   :  { %799 = vmatpush.bf16.msra.mxu3 %v2099_v58  ;;  %v2771_v24 = vld [vmem:[#allocation4 + $0x184] sm:$0xf0]  ;;  %v2801_v27 = vld [vmem:[#allocation4 + $0x274] sm:$0xf0]  ;;  %v2736_v28 = vld [vmem:[#allocation4 + $0x74] sm:$0xf]  ;;  %v2011_v36 = vor.u32 %v2755_v22, %v2010_v19 }
  0x33   :  { %773 = vmatpush.bf16.msra.mxu1 %v1971_v62  ;;  %v1940_v29 = vld [vmem:[#allocation4 + $0x78] sm:$0xf0]  ;;  %v1946_v30 = vld [vmem:[#allocation4 + $0x80] sm:$0xf]  ;;  %v2739_v31 = vld [vmem:[#allocation4 + $0x84] sm:$0xf0]  ;;  %v2075_v37 = vor.u32 %v2771_v24, %v2074_v23  ;;  %v2195_v41 = vor.u32 %v2801_v27, %v2194_v26 }
  0x34   :  { %761 = vmatpush.bf16.msra.mxu0 %v1899_v4  ;;  %v146_v33 = vld [vmem:[#allocation2 + $0x10] sm:$0xff]  ;;  %v2266_v34 = vld [vmem:[#allocation4 + $0x300] sm:$0xf]  ;;  %v2819_v35 = vld [vmem:[#allocation4 + $0x304] sm:$0xf0]  ;;  %v1943_v42 = vor.u32 %v2736_v28, %v1940_v29  ;;  %v1947_v46 = vor.u32 %v2739_v31, %v1946_v30  ;;  %vm752_vm0 = vcmask 130048  }
  0x35   :  { %787 = vmatpush.bf16.msra.mxu2 %v2027_v5  ;;  %v2258_v38 = vld [vmem:[#allocation4 + $0x2f0] sm:$0xf]  ;;  %v2817_v39 = vld [vmem:[#allocation4 + $0x2f4] sm:$0xf0]  ;;  %v2752_v40 = vld [vmem:[#allocation4 + $0xf4] sm:$0xf]  ;;  %v2267_v47 = vor.u32 %v2819_v35, %v2266_v34  ;;  %v3224_v51 = vpack.c.bf16 %v146_v33, %v146_v33 }
  0x36   :  { %800 = vmatpush.bf16.msra.mxu3 %v2091_v6  ;;  %v2004_v43 = vld [vmem:[#allocation4 + $0xf8] sm:$0xf0]  ;;  %v2186_v44 = vld [vmem:[#allocation4 + $0x260] sm:$0xf]  ;;  %v144_v45 = vld [vmem:[#allocation2] sm:$0xff]  ;;  %v2259_v52 = vor.u32 %v2817_v39, %v2258_v38 }
  0x37   :  { %774 = vmatpush.bf16.msra.mxu1 %v1963_v10  ;;  %v2799_v48 = vld [vmem:[#allocation4 + $0x264] sm:$0xf0]  ;;  %v2734_v49 = vld [vmem:[#allocation4 + $0x64] sm:$0xf]  ;;  %v1932_v50 = vld [vmem:[#allocation4 + $0x68] sm:$0xf0]  ;;  %v2007_v55 = vor.u32 %v2752_v40, %v2004_v43  ;;  %v3226_v58 = vpack.c.bf16 %v144_v45, %v144_v45 }
  0x38   :  { %762 = vmatpush.bf16.msra.mxu0 %v1891_v16  ;;  %v147_v53 = vld [vmem:[#allocation2 + $0x18] sm:$0xff]  ;;  %v145_v54 = vld [vmem:[#allocation2 + $0x8] sm:$0xff]  ;;  %v2815_v57 = vld [vmem:[#allocation4 + $0x2e4] sm:$0xf0]  ;;  %v2187_v59 = vor.u32 %v2799_v48, %v2186_v44  ;;  %v1935_v60 = vor.u32 %v2734_v49, %v1932_v50 }
  0x39   :  { %788 = vmatpush.bf16.msra.mxu2 %v2019_v20  ;;  %v2250_v56 = vld [vmem:[#allocation4 + $0x2e0] sm:$0xf]  ;;  %v2750_v61 = vld [vmem:[#allocation4 + $0xe4] sm:$0xf]  ;;  %v1996_v62 = vld [vmem:[#allocation4 + $0xe8] sm:$0xf0]  ;;  %v3228_v3 = vpack.c.bf16 %v147_v53, %v147_v53  ;;  %v3230_v4 = vpack.c.bf16 %v145_v54, %v145_v54 }
  0x3a   :  { %801 = vmatpush.bf16.msra.mxu3 %v2083_v21  ;;  %v2178_v63 = vld [vmem:[#allocation4 + $0x250] sm:$0xf]  ;;  %v2797_v0 = vld [vmem:[#allocation4 + $0x254] sm:$0xf0]  ;;  %v2732_v1 = vld [vmem:[#allocation4 + $0x54] sm:$0xf]  ;;  %v2251_v5 = vor.u32 %v2815_v57, %v2250_v56  ;;  %v1999_v6 = vor.u32 %v2750_v61, %v1996_v62 }
  0x3b   :  { %775 = vmatpush.bf16.msra.mxu1 %v1955_v25  ;;  %v1924_v2 = vld [vmem:[#allocation4 + $0x58] sm:$0xf0]  ;;  %v2242_v7 = vld [vmem:[#allocation4 + $0x2d0] sm:$0xf]  ;;  %v2813_v8 = vld [vmem:[#allocation4 + $0x2d4] sm:$0xf0]  ;;  %v2179_v9 = vor.u32 %v2797_v0, %v2178_v63 }
  0x3c   :  { %763 = vmatpush.bf16.msra.mxu0 %v1883_v32  ;;  %v1927_v10 = vor.u32 %v2732_v1, %v1924_v2  ;;  %v2748_v11 = vld [vmem:[#allocation4 + $0xd4] sm:$0xf]  ;;  %v1988_v12 = vld [vmem:[#allocation4 + $0xd8] sm:$0xf0]  ;;  %v2170_v13 = vld [vmem:[#allocation4 + $0x240] sm:$0xf]  ;;  %v2243_v17 = vor.u32 %v2813_v8, %v2242_v7 }
  0x3d   :  { %789 = vmatpush.bf16.msra.mxu2 %v2011_v36  ;;  %v2795_v14 = vld [vmem:[#allocation4 + $0x244] sm:$0xf0]  ;;  %v2730_v15 = vld [vmem:[#allocation4 + $0x44] sm:$0xf]  ;;  %v1916_v16 = vld [vmem:[#allocation4 + $0x48] sm:$0xf0]  ;;  %v1991_v18 = vor.u32 %v2748_v11, %v1988_v12 }
  0x3e   :  { %802 = vmatpush.bf16.msra.mxu3 %v2075_v37  ;;  %v2234_v19 = vld [vmem:[#allocation4 + $0x2c0] sm:$0xf]  ;;  %v2811_v20 = vld [vmem:[#allocation4 + $0x2c4] sm:$0xf0]  ;;  %v2171_v21 = vor.u32 %v2795_v14, %v2170_v13  ;;  %v1919_v22 = vor.u32 %v2730_v15, %v1916_v16  ;;  %v2746_v23 = vld [vmem:[#allocation4 + $0xc4] sm:$0xf] }
  0x3f   :  { %776 = vmatpush.bf16.msra.mxu1 %v1947_v46  ;;  %764 = vmatmul.bf16.vlgmr.msra.gmra.mxu0 %v3226_v58  ;;  %v1980_v24 = vld [vmem:[#allocation4 + $0xc8] sm:$0xf0]  ;;  %v2162_v25 = vld [vmem:[#allocation4 + $0x230] sm:$0xf]  ;;  %v2793_v26 = vld [vmem:[#allocation4 + $0x234] sm:$0xf0]  ;;  %v2235_v29 = vor.u32 %v2811_v20, %v2234_v19 }
  0x40   :  { %808 = vmatpush.bf16.msrb.mxu0 %v2195_v41  ;;  %790 = vmatmul.bf16.vlgmr.msra.gmra.mxu2 %v3224_v51  ;;  %v2728_v27 = vld [vmem:[#allocation4 + $0x34] sm:$0xf]  ;;  %v1908_v28 = vld [vmem:[#allocation4 + $0x38] sm:$0xf0]  ;;  %v1983_v30 = vor.u32 %v2746_v23, %v1980_v24  ;;  %v2226_v31 = vld [vmem:[#allocation4 + $0x2b0] sm:$0xf]  ;;  %v2163_v34 = vor.u32 %v2793_v26, %v2162_v25 }
  0x41   :  { %841 = vmatpush.bf16.msrb.mxu2 %v2267_v47  ;;  %803 = vmatmul.bf16.vlgmr.msra.gmra.mxu3 %v3228_v3  ;;  %v2809_v32 = vld [vmem:[#allocation4 + $0x2b4] sm:$0xf0]  ;;  %v1911_v35 = vor.u32 %v2728_v27, %v1908_v28  ;;  %v2744_v36 = vld [vmem:[#allocation4 + $0xb4] sm:$0xf]  ;;  %v1972_v37 = vld [vmem:[#allocation4 + $0xb8] sm:$0xf0] }
  0x42   :  { %847 = vmatpush.bf16.msrb.mxu3 %v1943_v42  ;;  %777 = vmatmul.bf16.vlgmr.msra.gmra.mxu1 %v3230_v4  ;;  %v150_v33 = vld [vmem:[#allocation2 + $0x30] sm:$0xff]  ;;  %v2154_v38 = vld [vmem:[#allocation4 + $0x220] sm:$0xf]  ;;  %v2791_v39 = vld [vmem:[#allocation4 + $0x224] sm:$0xf0]  ;;  %v2227_v42 = vor.u32 %v2809_v32, %v2226_v31  ;;  %v1975_v44 = vor.u32 %v2744_v36, %v1972_v37 }
  0x43   :  { %821 = vmatpush.bf16.msrb.mxu1 %v2259_v52  ;;  %v2726_v40 = vld [vmem:[#allocation4 + $0x24] sm:$0xf]  ;;  %v1900_v41 = vld [vmem:[#allocation4 + $0x28] sm:$0xf0]  ;;  %v3236_v43 = vpack.c.bf16 %v150_v33, %v150_v33  ;;  %v2218_v45 = vld [vmem:[#allocation4 + $0x2a0] sm:$0xf]  ;;  %v2155_v47 = vor.u32 %v2791_v39, %v2154_v38 }
  0x44   :  { %809 = vmatpush.bf16.msrb.mxu0 %v2187_v59  ;;  %v2807_v46 = vld [vmem:[#allocation4 + $0x2a4] sm:$0xf0]  ;;  %v1903_v48 = vor.u32 %v2726_v40, %v1900_v41  ;;  %v2742_v49 = vld [vmem:[#allocation4 + $0xa4] sm:$0xf]  ;;  %v1964_v50 = vld [vmem:[#allocation4 + $0xa8] sm:$0xf0] }
  0x45   :  { %860 = vmatpush.bf16.msra.mxu2 %v2007_v55  ;;  %v2146_v52 = vld [vmem:[#allocation4 + $0x210] sm:$0xf]  ;;  %v2789_v53 = vld [vmem:[#allocation4 + $0x214] sm:$0xf0]  ;;  %v2724_v54 = vld [vmem:[#allocation4 + $0x14] sm:$0xf]  ;;  %v2219_v56 = vor.u32 %v2807_v46, %v2218_v45  ;;  %v1967_v57 = vor.u32 %v2742_v49, %v1964_v50 }
  0x46   :  { %848 = vmatpush.bf16.msrb.mxu3 %v1935_v60  ;;  %v1892_v55 = vld [vmem:[#allocation4 + $0x18] sm:$0xf0]  ;;  %v2210_v59 = vld [vmem:[#allocation4 + $0x290] sm:$0xf]  ;;  %v2805_v60 = vld [vmem:[#allocation4 + $0x294] sm:$0xf0]  ;;  %v2147_v62 = vor.u32 %v2789_v53, %v2146_v52 }
  0x47   :  { %822 = vmatpush.bf16.msrb.mxu1 %v2251_v5  ;;  %v2740_v61 = vld [vmem:[#allocation4 + $0x94] sm:$0xf]  ;;  %v1895_v63 = vor.u32 %v2724_v54, %v1892_v55  ;;  %v1956_v0 = vld [vmem:[#allocation4 + $0x98] sm:$0xf0]  ;;  %v2138_v1 = vld [vmem:[#allocation4 + $0x200] sm:$0xf]  ;;  %v2211_v8 = vor.u32 %v2805_v60, %v2210_v59 }
  0x48   :  { %810 = vmatpush.bf16.msrb.mxu0 %v2179_v9  ;;  %v2787_v2 = vld [vmem:[#allocation4 + $0x204] sm:$0xf0]  ;;  %v2722_v5 = vld [vmem:[#allocation4 + $0x4] sm:$0xf]  ;;  %v2768_v7 = vld [vmem:[#allocation4 + $0x174] sm:$0xf]  ;;  %v1959_v12 = vor.u32 %v2740_v61, %v1956_v0 }
  0x49   :  { %861 = vmatpush.bf16.msra.mxu2 %v1999_v6  ;;  %v1884_v6 = vld [vmem:[#allocation4 + $0x8] sm:$0xf0]  ;;  %v2068_v9 = vld [vmem:[#allocation4 + $0x178] sm:$0xf0]  ;;  %v2202_v13 = vld [vmem:[#allocation4 + $0x280] sm:$0xf]  ;;  %v2139_v16 = vor.u32 %v2787_v2, %v2138_v1 }
  0x4a   :  { %849 = vmatpush.bf16.msrb.mxu3 %v1927_v10  ;;  %v2800_v10 = vld [vmem:[#allocation4 + $0x274] sm:$0xf]  ;;  %v2196_v11 = vld [vmem:[#allocation4 + $0x278] sm:$0xf0]  ;;  %v2803_v14 = vld [vmem:[#allocation4 + $0x284] sm:$0xf0] }
  0x4b   :  { %823 = vmatpush.bf16.msrb.mxu1 %v2243_v17  ;;  %v148_v15 = vld [vmem:[#allocation2 + $0x20] sm:$0xff]  ;;  %v1887_v17 = vor.u32 %v2722_v5, %v1884_v6  ;;  %v2784_v20 = vld [vmem:[#allocation4 + $0x1f4] sm:$0xf]  ;;  %v2132_v23 = vld [vmem:[#allocation4 + $0x1f8] sm:$0xf0]  ;;  %v2203_v26 = vor.u32 %v2803_v14, %v2202_v13 }
  0x4c   :  { %811 = vmatpush.bf16.msrb.mxu0 %v2171_v21  ;;  %v1948_v19 = vld [vmem:[#allocation4 + $0x88] sm:$0xf0]  ;;  %v2071_v21 = vor.u32 %v2768_v7, %v2068_v9  ;;  %v2816_v24 = vld [vmem:[#allocation4 + $0x2f4] sm:$0xf]  ;;  %v2260_v25 = vld [vmem:[#allocation4 + $0x2f8] sm:$0xf0] }
  0x4d   :  { %862 = vmatpush.bf16.msra.mxu2 %v1991_v18  ;;  %v2738_v18 = vld [vmem:[#allocation4 + $0x84] sm:$0xf]  ;;  %v149_v27 = vld [vmem:[#allocation2 + $0x28] sm:$0xff]  ;;  %v2188_v33 = vld [vmem:[#allocation4 + $0x268] sm:$0xf0] }
  0x4e   :  { %850 = vmatpush.bf16.msrb.mxu3 %v1919_v22  ;;  %v2199_v22 = vor.u32 %v2800_v10, %v2196_v11  ;;  %v2766_v28 = vld [vmem:[#allocation4 + $0x164] sm:$0xf]  ;;  %v1951_v31 = vor.u32 %v2738_v18, %v1948_v19  ;;  %v3242_v37 = vpack.c.bf16 %v149_v27, %v149_v27  ;;  %v2124_v39 = vld [vmem:[#allocation4 + $0x1e8] sm:$0xf0]  ;;  %v2052_v45 = vld [vmem:[#allocation4 + $0x158] sm:$0xf0] }
  0x4f   :  { %824 = vmatpush.bf16.msrb.mxu1 %v2235_v29  ;;  %v2060_v29 = vld [vmem:[#allocation4 + $0x168] sm:$0xf0]  ;;  %v2798_v32 = vld [vmem:[#allocation4 + $0x264] sm:$0xf]  ;;  %v2796_v46 = vld [vmem:[#allocation4 + $0x254] sm:$0xf] }
  0x50   :  { %812 = vmatpush.bf16.msrb.mxu0 %v2163_v34  ;;  %2272 = vmatmul.msk.bf16.vlgmr.msrb.gmra.mxu2 %vm752_vm0, %v3236_v43  ;;  %v2135_v34 = vor.u32 %v2784_v20, %v2132_v23  ;;  %v2782_v36 = vld [vmem:[#allocation4 + $0x1e4] sm:$0xf]  ;;  %v2063_v38 = vor.u32 %v2766_v28, %v2060_v29  ;;  %v2252_v41 = vld [vmem:[#allocation4 + $0x2e8] sm:$0xf0]  ;;  %v2780_v50 = vld [vmem:[#allocation4 + $0x1d4] sm:$0xf] }
  0x51   :  { %863 = vmatpush.bf16.msra.mxu2 %v1983_v30  ;;  %v3240_v30 = vpack.c.bf16 %v148_v15, %v148_v15  ;;  %v2814_v40 = vld [vmem:[#allocation4 + $0x2e4] sm:$0xf]  ;;  %v2116_v53 = vld [vmem:[#allocation4 + $0x1d8] sm:$0xf0]  ;;  %v2812_v54 = vld [vmem:[#allocation4 + $0x2d4] sm:$0xf] }
  0x52   :  { %851 = vmatpush.bf16.msrb.mxu3 %v1911_v35  ;;  %v2263_v35 = vor.u32 %v2816_v24, %v2260_v25  ;;  %v2255_v49 = vor.u32 %v2814_v40, %v2252_v41  ;;  %v2244_v55 = vld [vmem:[#allocation4 + $0x2d8] sm:$0xf0]  ;;  %v2044_v59 = vld [vmem:[#allocation4 + $0x148] sm:$0xf0]  ;;  %v2794_v60 = vld [vmem:[#allocation4 + $0x244] sm:$0xf] }
  0x53   :  { %825 = vmatpush.bf16.msrb.mxu1 %v2227_v42  ;;  %v2191_v42 = vor.u32 %v2798_v32, %v2188_v33  ;;  %v2172_v61 = vld [vmem:[#allocation4 + $0x248] sm:$0xf0]  ;;  %v2778_v0 = vld [vmem:[#allocation4 + $0x1c4] sm:$0xf]  ;;  %v2036_v9 = vld [vmem:[#allocation4 + $0x138] sm:$0xf0] }
  0x54   :  { %813 = vmatpush.bf16.msrb.mxu0 %v2155_v47  ;;  %v2180_v47 = vld [vmem:[#allocation4 + $0x258] sm:$0xf0]  ;;  %v2108_v2 = vld [vmem:[#allocation4 + $0x1c8] sm:$0xf0]  ;;  %v2810_v5 = vld [vmem:[#allocation4 + $0x2c4] sm:$0xf]  ;;  %v2175_v7 = vor.u32 %v2794_v60, %v2172_v61 }
  0x55   :  { %864 = vmatpush.bf16.msra.mxu2 %v1975_v44  ;;  %v2764_v44 = vld [vmem:[#allocation4 + $0x154] sm:$0xf]  ;;  %v2236_v6 = vld [vmem:[#allocation4 + $0x2c8] sm:$0xf0]  ;;  %v2111_v11 = vor.u32 %v2778_v0, %v2108_v2  ;;  %v2100_v14 = vld [vmem:[#allocation4 + $0x1b8] sm:$0xf0] }
  0x56   :  { %852 = vmatpush.bf16.msrb.mxu3 %v1903_v48  ;;  %v2127_v48 = vor.u32 %v2782_v36, %v2124_v39  ;;  %v2055_v52 = vor.u32 %v2764_v44, %v2052_v45  ;;  %v2792_v10 = vld [vmem:[#allocation4 + $0x234] sm:$0xf]  ;;  %v2758_v18 = vld [vmem:[#allocation4 + $0x124] sm:$0xf]  ;;  %v2028_v19 = vld [vmem:[#allocation4 + $0x128] sm:$0xf0] }
  0x57   :  { %826 = vmatpush.bf16.msrb.mxu1 %v2219_v56  ;;  %v2183_v56 = vor.u32 %v2796_v46, %v2180_v47  ;;  %v2808_v15 = vld [vmem:[#allocation4 + $0x2b4] sm:$0xf]  ;;  %v2790_v20 = vld [vmem:[#allocation4 + $0x224] sm:$0xf]  ;;  %v2031_v25 = vor.u32 %v2758_v18, %v2028_v19  ;;  %v2220_v28 = vld [vmem:[#allocation4 + $0x2a8] sm:$0xf0] }
  0x58   :  { %814 = vmatpush.bf16.msrb.mxu0 %v2147_v62  ;;  %v2119_v62 = vor.u32 %v2780_v50, %v2116_v53  ;;  %v2774_v24 = vld [vmem:[#allocation4 + $0x1a4] sm:$0xf]  ;;  %v2020_v32 = vld [vmem:[#allocation4 + $0x118] sm:$0xf0]  ;;  %v2788_v33 = vld [vmem:[#allocation4 + $0x214] sm:$0xf] }
  0x59   :  { %865 = vmatpush.bf16.msra.mxu2 %v1967_v57  ;;  %v2762_v57 = vld [vmem:[#allocation4 + $0x144] sm:$0xf]  ;;  %v2084_v40 = vld [vmem:[#allocation4 + $0x198] sm:$0xf0]  ;;  %v2804_v41 = vld [vmem:[#allocation4 + $0x294] sm:$0xf] }
  0x5a   :  { %853 = vmatpush.bf16.msrb.mxu3 %v1895_v63  ;;  %v2247_v63 = vor.u32 %v2812_v54, %v2244_v55  ;;  %v2047_v1 = vor.u32 %v2762_v57, %v2044_v59  ;;  %v2806_v27 = vld [vmem:[#allocation4 + $0x2a4] sm:$0xf]  ;;  %v2012_v46 = vld [vmem:[#allocation4 + $0x108] sm:$0xf0] }
  0x5b   :  { %827 = vmatpush.bf16.msrb.mxu1 %v2211_v8  ;;  %v2760_v8 = vld [vmem:[#allocation4 + $0x134] sm:$0xf]  ;;  %v2223_v36 = vor.u32 %v2806_v27, %v2220_v28  ;;  %v2754_v45 = vld [vmem:[#allocation4 + $0x104] sm:$0xf]  ;;  %v2268_v50 = vld [vmem:[#allocation4 + $0x308] sm:$0xf0] }
  0x5c   :  { %815 = vmatpush.bf16.msrb.mxu0 %v2139_v16  ;;  %v2039_v13 = vor.u32 %v2760_v8, %v2036_v9  ;;  %v2228_v16 = vld [vmem:[#allocation4 + $0x2b8] sm:$0xf0]  ;;  %v2786_v47 = vld [vmem:[#allocation4 + $0x204] sm:$0xf]  ;;  %v2015_v54 = vor.u32 %v2754_v45, %v2012_v46  ;;  %v2204_v60 = vld [vmem:[#allocation4 + $0x288] sm:$0xf0] }
  0x5d   :  { %866 = vmatpush.bf16.msra.mxu2 %v1959_v12  ;;  %v2776_v12 = vld [vmem:[#allocation4 + $0x1b4] sm:$0xf]  ;;  %v2231_v23 = vor.u32 %v2808_v15, %v2228_v16  ;;  %v2770_v55 = vld [vmem:[#allocation4 + $0x184] sm:$0xf]  ;;  %v2310_v16 = vld [vmem:[#allocation7 + $0x48] sm:$0xf0] }
  0x5e   :  { %854 = vmatpush.bf16.msrb.mxu3 %v1887_v17  ;;  %v2802_v59 = vld [vmem:[#allocation4 + $0x284] sm:$0xf]  ;;  %v2324_v8 = vld [vmem:[#allocation7 + $0x60] sm:$0xf]  ;;  %v2832_v9 = vld [vmem:[#allocation7 + $0x64] sm:$0xf] }
  0x5f   :  { %828 = vmatpush.bf16.msrb.mxu1 %v2203_v26  ;;  %816 = vmatmul.bf16.vlgmr.msrb.gmra.mxu0 %v3240_v30  ;;  %v2092_v26 = vld [vmem:[#allocation4 + $0x1a8] sm:$0xf0]  ;;  %v2332_v0 = vld [vmem:[#allocation7 + $0x70] sm:$0xf]  ;;  %v2828_v15 = vld [vmem:[#allocation7 + $0x44] sm:$0xf] }
  0x60   :  { %873 = vmatpush.bf16.msra.mxu0 %v2071_v21  ;;  %v2156_v21 = vld [vmem:[#allocation4 + $0x228] sm:$0xf0]  ;;  %v2313_v18 = vor.u32 %v2828_v15, %v2310_v16  ;;  %v2300_v19 = vld [vmem:[#allocation7 + $0x30] sm:$0xf]  ;;  %v2824_v27 = vld [vmem:[#allocation7 + $0x24] sm:$0xf] }
  0x61   :  { %867 = vmatpush.bf16.msra.mxu2 %v1951_v31  ;;  %855 = vmatmul.bf16.vlgmr.msrb.gmra.mxu3 %v3226_v58  ;;  %v2239_v58 = vor.u32 %v2810_v5, %v2236_v6  ;;  %v2159_v29 = vor.u32 %v2790_v20, %v2156_v21  ;;  %v2756_v31 = vld [vmem:[#allocation4 + $0x114] sm:$0xf]  ;;  %v2834_v5 = vld [vmem:[#allocation7 + $0x74] sm:$0xf]  ;;  %v2334_v6 = vld [vmem:[#allocation7 + $0x78] sm:$0xf0] }
  0x62   :  { %899 = vmatpush.bf16.msra.mxu3 %v2199_v22  ;;  %829 = vmatmul.bf16.vlgmr.msrb.gmra.mxu1 %v3242_v37  ;;  %v2103_v22 = vor.u32 %v2776_v12, %v2100_v14  ;;  %v2023_v39 = vor.u32 %v2756_v31, %v2020_v32  ;;  %v2829_v14 = vld [vmem:[#allocation7 + $0x44] sm:$0xf0]  ;;  %v2827_v20 = vld [vmem:[#allocation7 + $0x34] sm:$0xf0]  ;;  %v2826_v21 = vld [vmem:[#allocation7 + $0x34] sm:$0xf] }
  0x63   :  { %886 = vmatpush.bf16.msra.mxu1 %v2135_v34  ;;  %v2148_v34 = vld [vmem:[#allocation4 + $0x218] sm:$0xf0]  ;;  %v2372_v15 = vld [vmem:[#allocation7 + $0xc0] sm:$0xf] }
  0x64   :  { %874 = vmatpush.bf16.msra.mxu0 %v2063_v38  ;;  %868 = vmatmul.bf16.vlgmr.msra.gmra.mxu2 %v3230_v4  ;;  %v2164_v4 = vld [vmem:[#allocation4 + $0x238] sm:$0xf0]  ;;  %v2772_v38 = vld [vmem:[#allocation4 + $0x194] sm:$0xf]  ;;  %v2151_v44 = vor.u32 %v2788_v33, %v2148_v34  ;;  %v2284_v33 = vld [vmem:[#allocation7 + $0x10] sm:$0xf] }
  0x65   :  { %912 = vmatpush.bf16.msrb.mxu2 %v2263_v35  ;;  %v2167_v17 = vor.u32 %v2792_v10, %v2164_v4  ;;  %v2095_v35 = vor.u32 %v2774_v24, %v2092_v26  ;;  %v2326_v10 = vld [vmem:[#allocation7 + $0x68] sm:$0xf0]  ;;  %v2316_v4 = vld [vmem:[#allocation7 + $0x50] sm:$0xf]  ;;  %v2825_v26 = vld [vmem:[#allocation7 + $0x24] sm:$0xf0] }
  0x66   :  { %900 = vmatpush.bf16.msra.mxu3 %v2191_v42  ;;  %v2212_v42 = vld [vmem:[#allocation4 + $0x298] sm:$0xf0]  ;;  %v2823_v34 = vld [vmem:[#allocation7 + $0x14] sm:$0xf0] }
  0x67   :  { %887 = vmatpush.bf16.msra.mxu1 %v2127_v48  ;;  %v2140_v48 = vld [vmem:[#allocation4 + $0x208] sm:$0xf0]  ;;  %v2215_v53 = vor.u32 %v2804_v41, %v2212_v42  ;;  %v2276_v41 = vld [vmem:[#allocation7] sm:$0xf]  ;;  %v2821_v42 = vld [vmem:[#allocation7 + $0x4] sm:$0xf0] }
  0x68   :  { %875 = vmatpush.bf16.msra.mxu0 %v2055_v52  ;;  %v2087_v52 = vor.u32 %v2772_v38, %v2084_v40  ;;  %v2143_v57 = vor.u32 %v2786_v47, %v2140_v48  ;;  %v2286_v38 = vld [vmem:[#allocation7 + $0x18] sm:$0xf0]  ;;  %v2277_v46 = vor.u32 %v2821_v42, %v2276_v41  ;;  %v2278_v47 = vld [vmem:[#allocation7 + $0x8] sm:$0xf0]  ;;  %v2845_v16 = vld [vmem:[#allocation7 + $0xc4] sm:$0xf0] }
  0x69   :  { %913 = vmatpush.bf16.msrb.mxu2 %v2255_v49  ;;  %v2818_v49 = vld [vmem:[#allocation4 + $0x304] sm:$0xf]  ;;  %v2358_v42 = vld [vmem:[#allocation7 + $0xa8] sm:$0xf0] }
  0x6a   :  { %901 = vmatpush.bf16.msra.mxu3 %v2183_v56  ;;  %v2076_v56 = vld [vmem:[#allocation4 + $0x188] sm:$0xf0]  ;;  %v2271_v61 = vor.u32 %v2818_v49, %v2268_v50  ;;  %v3254_v49 = vld [vmem:[#allocation6] sm:$0x3] }
  0x6b   :  { %888 = vmatpush.bf16.msra.mxu1 %v2119_v62  ;;  %v2079_v62 = vor.u32 %v2770_v55, %v2076_v56 }
  0x6c   :  { %876 = vmatpush.bf16.msra.mxu0 %v2047_v1  ;;  %v2835_v1 = vld [vmem:[#allocation7 + $0x74] sm:$0xf0] }
  0x6d   :  { %914 = vmatpush.bf16.msrb.mxu2 %v2247_v63  ;;  %v2207_v63 = vor.u32 %v2802_v59, %v2204_v60  ;;  %v2333_v2 = vor.u32 %v2835_v1, %v2332_v0  ;;  %v2398_v59 = vld [vmem:[#allocation7 + $0xf8] sm:$0xf0]  ;;  %v258_v60 = vperm.slane %v3254_v49, 0  ;;  %v2849_v0 = vld [vmem:[#allocation7 + $0xe4] sm:$0xf0] }
  0x6e   :  { %902 = vmatpush.bf16.msra.mxu3 %v2175_v7  ;;  %v2337_v7 = vor.u32 %v2834_v5, %v2334_v6  ;;  %v2848_v1 = vld [vmem:[#allocation7 + $0xe4] sm:$0xf]  ;;  %v2390_v6 = vld [vmem:[#allocation7 + $0xe8] sm:$0xf0] }
  0x6f   :  { %889 = vmatpush.bf16.msra.mxu1 %v2111_v11  ;;  %v2329_v11 = vor.u32 %v2832_v9, %v2326_v10  ;;  %v2380_v10 = vld [vmem:[#allocation7 + $0xd0] sm:$0xf] }
  0x70   :  { %877 = vmatpush.bf16.msra.mxu0 %v2039_v13  ;;  %v2308_v13 = vld [vmem:[#allocation7 + $0x40] sm:$0xf] }
  0x71   :  { %915 = vmatpush.bf16.msrb.mxu2 %v2239_v58  ;;  %v2318_v58 = vld [vmem:[#allocation7 + $0x58] sm:$0xf0] }
  0x72   :  { %903 = vmatpush.bf16.msra.mxu3 %v2167_v17  ;;  %v2309_v17 = vor.u32 %v2829_v14, %v2308_v13 }
  0x73   :  { %890 = vmatpush.bf16.msra.mxu1 %v2103_v22  ;;  %v2302_v22 = vld [vmem:[#allocation7 + $0x38] sm:$0xf0] }
  0x74   :  { %878 = vmatpush.bf16.msra.mxu0 %v2031_v25  ;;  %v2305_v24 = vor.u32 %v2826_v21, %v2302_v22  ;;  %v2292_v25 = vld [vmem:[#allocation7 + $0x20] sm:$0xf] }
  0x75   :  { %916 = vmatpush.bf16.msrb.mxu2 %v2231_v23  ;;  %v2301_v23 = vor.u32 %v2827_v20, %v2300_v19  ;;  %v2293_v28 = vor.u32 %v2825_v26, %v2292_v25  ;;  %v2373_v19 = vor.u32 %v2845_v16, %v2372_v15  ;;  %v2374_v20 = vld [vmem:[#allocation7 + $0xc8] sm:$0xf0]  ;;  %v2843_v25 = vld [vmem:[#allocation7 + $0xb4] sm:$0xf0]  ;;  %v2842_v26 = vld [vmem:[#allocation7 + $0xb4] sm:$0xf] }
  0x76   :  { %904 = vmatpush.bf16.msra.mxu3 %v2159_v29  ;;  %v2294_v29 = vld [vmem:[#allocation7 + $0x28] sm:$0xf0]  ;;  %v2867_v15 = vld [vmem:[#allocation9 + $0x74] sm:$0xf0]  ;;  %v2524_v16 = vld [vmem:[#allocation9 + $0xf0] sm:$0xf] }
  0x77   :  { %891 = vmatpush.bf16.msra.mxu1 %v2095_v35  ;;  %v2297_v31 = vor.u32 %v2824_v27, %v2294_v29  ;;  %v2822_v35 = vld [vmem:[#allocation7 + $0x14] sm:$0xf] }
  0x78   :  { %879 = vmatpush.bf16.msra.mxu0 %v2023_v39  ;;  %v2289_v40 = vor.u32 %v2822_v35, %v2286_v38  ;;  %v2356_v35 = vld [vmem:[#allocation7 + $0xa0] sm:$0xf]  ;;  %v2840_v38 = vld [vmem:[#allocation7 + $0xa4] sm:$0xf] }
  0x79   :  { %917 = vmatpush.bf16.msrb.mxu2 %v2223_v36  ;;  %v2285_v36 = vor.u32 %v2823_v34, %v2284_v33 }
  0x7a   :  { %905 = vmatpush.bf16.msra.mxu3 %v2151_v44  ;;  %v2820_v44 = vld [vmem:[#allocation7 + $0x4] sm:$0xf] }
  0x7b   :  { %892 = vmatpush.bf16.msra.mxu1 %v2087_v52  ;;  %v2281_v48 = vor.u32 %v2820_v44, %v2278_v47  ;;  %v2839_v47 = vld [vmem:[#allocation7 + $0x94] sm:$0xf0] }
  0x7c   :  { %880 = vmatpush.bf16.msra.mxu0 %v2015_v54  ;;  %v2851_v54 = vld [vmem:[#allocation7 + $0xf4] sm:$0xf0] }
  0x7d   :  { %918 = vmatpush.bf16.msrb.mxu2 %v2215_v53  ;;  %v2396_v53 = vld [vmem:[#allocation7 + $0xf0] sm:$0xf] }
  0x7e   :  { %906 = vmatpush.bf16.msra.mxu3 %v2143_v57  ;;  %v2397_v56 = vor.u32 %v2851_v54, %v2396_v53  ;;  %v2850_v57 = vld [vmem:[#allocation7 + $0xf4] sm:$0xf] }
  0x7f   :  { %893 = vmatpush.bf16.msra.mxu1 %v2079_v62  ;;  %881 = vmatmul.bf16.vlgmr.msra.gmra.mxu0 %v3224_v51  ;;  %v2833_v51 = vld [vmem:[#allocation7 + $0x64] sm:$0xf0] }
  0x80   :  { %932 = vmatpush.bf16.msrb.mxu0 %v2271_v61  ;;  %v2401_v61 = vor.u32 %v2850_v57, %v2398_v59  ;;  %v2836_v57 = vld [vmem:[#allocation7 + $0x84] sm:$0xf] }
  0x81   :  { %907 = vmatmul.bf16.vlgmr.msra.gmra.mxu3 %v3240_v30  ;;  %919 = vmatpush.bf16.msrb.mxu2 %v2207_v63  ;;  %v2325_v30 = vor.u32 %v2833_v51, %v2324_v8  ;;  %v2388_v63 = vld [vmem:[#allocation7 + $0xe0] sm:$0xf]  ;;  %v2393_v8 = vor.u32 %v2848_v1, %v2390_v6 }
  0x82   :  { %894 = vmatmul.bf16.vlgmr.msra.gmra.mxu1 %v3228_v3  ;;  %v2831_v3 = vld [vmem:[#allocation7 + $0x54] sm:$0xf0]  ;;  %1155 = vmatpush.bf16.msrb.mxu3 %v2397_v56  ;;  %v2389_v5 = vor.u32 %v2849_v0, %v2388_v63  ;;  %v2837_v56 = vld [vmem:[#allocation7 + $0x84] sm:$0xf0]  ;;  %v259_v63 = vperm.slane %v3254_v49, 1 }
  0x83   :  { %1142 = vmatpush.bf16.msrb.mxu1 %v2333_v2 }
  0x84   :  { %920 = vmatmul.bf16.vlgmr.msrb.gmra.mxu2 %v3242_v37  ;;  %1168 = vmatpush.bf16.msra.mxu0 %v2337_v7  ;;  %v2830_v37 = vld [vmem:[#allocation7 + $0x54] sm:$0xf] }
  0x85   :  { %v2321_v12 = vor.u32 %v2830_v37, %v2318_v58  ;;  %1181 = vmatpush.bf16.msra.mxu2 %v2401_v61  ;;  %v2382_v37 = vld [vmem:[#allocation7 + $0xd8] sm:$0xf0]  ;;  %v2342_v61 = vld [vmem:[#allocation7 + $0x88] sm:$0xf0] }
  0x86   :  { %1156 = vmatpush.bf16.msrb.mxu3 %v2389_v5 }
  0x87   :  { %1143 = vmatpush.bf16.msrb.mxu1 %v2325_v30 }
  0x88   :  { %1169 = vmatpush.bf16.msra.mxu0 %v2329_v11 }
  0x89   :  { %1182 = vmatpush.bf16.msra.mxu2 %v2393_v8 }
  0x8c   :  { %1170 = vmatpush.bf16.msra.mxu0 %v2321_v12 }
  0x8f   :  { %2273 = vmatmul.msk.bf16.vlgmr.msrb.gmra.mxu0 %vm752_vm0, %v3236_v43  ;;  %v2317_v43 = vor.u32 %v2831_v3, %v2316_v4  ;;  %v2847_v4 = vld [vmem:[#allocation7 + $0xd4] sm:$0xf0]  ;;  %v2846_v3 = vld [vmem:[#allocation7 + $0xd4] sm:$0xf] }
  0x90   :  { %1171 = vmatpush.bf16.msra.mxu0 %v2313_v18  ;;  %v2381_v11 = vor.u32 %v2847_v4, %v2380_v10 }
  0x91   :  { %1144 = vmatpush.bf16.msrb.mxu1 %v2317_v43  ;;  %v2385_v43 = vor.u32 %v2846_v3, %v2382_v37 }
  0x92   :  { %1157 = vmatpush.bf16.msrb.mxu3 %v2381_v11 }
  0x93   :  { %1183 = vmatpush.bf16.msra.mxu2 %v2385_v43 }
  0x94   :  { %1172 = vmatpush.bf16.msra.mxu0 %v2305_v24  ;;  %v2364_v24 = vld [vmem:[#allocation7 + $0xb0] sm:$0xf] }
  0x95   :  { %1145 = vmatpush.bf16.msrb.mxu1 %v2309_v17  ;;  %v2844_v17 = vld [vmem:[#allocation7 + $0xc4] sm:$0xf]  ;;  %v2365_v27 = vor.u32 %v2843_v25, %v2364_v24  ;;  %v2526_v24 = vld [vmem:[#allocation9 + $0xf8] sm:$0xf0]  ;;  %v2452_v25 = vld [vmem:[#allocation9 + $0x60] sm:$0xf] }
  0x96   :  { %v2377_v22 = vor.u32 %v2844_v17, %v2374_v20  ;;  %1158 = vmatpush.bf16.msrb.mxu3 %v2373_v19  ;;  %v2866_v19 = vld [vmem:[#allocation9 + $0x74] sm:$0xf]  ;;  %v2462_v20 = vld [vmem:[#allocation9 + $0x78] sm:$0xf0] }
  0x98   :  { %1173 = vmatpush.bf16.msra.mxu0 %v2297_v31  ;;  %1184 = vmatpush.bf16.msra.mxu2 %v2377_v22  ;;  %v2465_v22 = vor.u32 %v2866_v19, %v2462_v20 }
  0x99   :  { %1146 = vmatpush.bf16.msrb.mxu1 %v2301_v23 }
  0x9a   :  { %1159 = vmatpush.bf16.msrb.mxu3 %v2365_v27  ;;  %v2865_v27 = vld [vmem:[#allocation9 + $0x64] sm:$0xf0] }
  0x9c   :  { %1174 = vmatpush.bf16.msra.mxu0 %v2289_v40 }
  0x9d   :  { %1147 = vmatpush.bf16.msrb.mxu1 %v2293_v28  ;;  %v2366_v28 = vld [vmem:[#allocation7 + $0xb8] sm:$0xf0] }
  0x9e   :  { %v2369_v31 = vor.u32 %v2842_v26, %v2366_v28  ;;  %v2516_v28 = vld [vmem:[#allocation9 + $0xe0] sm:$0xf] }
  0xa0   :  { %1175 = vmatpush.bf16.msra.mxu0 %v2281_v48  ;;  %1185 = vmatpush.bf16.msra.mxu2 %v2369_v31  ;;  %v2838_v48 = vld [vmem:[#allocation7 + $0x94] sm:$0xf]  ;;  %v2453_v31 = vor.u32 %v2865_v27, %v2452_v25  ;;  %v2855_v27 = vld [vmem:[#allocation9 + $0x14] sm:$0xf0] }
  0xa1   :  { %1148 = vmatpush.bf16.msrb.mxu1 %v2285_v36  ;;  %v2841_v36 = vld [vmem:[#allocation7 + $0xa4] sm:$0xf0] }
  0xa2   :  { %v2357_v41 = vor.u32 %v2841_v36, %v2356_v35  ;;  %v2880_v35 = vld [vmem:[#allocation9 + $0xe4] sm:$0xf] }
  0xa4   :  { %1160 = vmatpush.bf16.msrb.mxu3 %v2357_v41  ;;  %1424 = vmatpush.bf16.msrb.mxu0 %v2465_v22 }
  0xa5   :  { %1149 = vmatpush.bf16.msrb.mxu1 %v2277_v46  ;;  %v2348_v46 = vld [vmem:[#allocation7 + $0x90] sm:$0xf] }
  0xbc   :  { %v765_v32 = vpop.f32.mrf.mxu0 }
  0xbd   :  { %v766_v2 = vadd.f32 %v765_v32, %v258_v60 }
  0xbf   :  { %v778_v39 = vpop.f32.mrf.mxu1 }
  0xc0   :  { %v779_v51 = vadd.f32 %v778_v39, %v766_v2 }
  0xc3   :  { %v791_v45 = vpop.f32.mrf.mxu2 }
  0xc4   :  { %v804_v50 = vpop.f32.mrf.mxu3  ;;  %v767_v52 = vpop.f32.mrf.mxu0  ;;  %v792_v30 = vadd.f32 %v791_v45, %v779_v51  ;;  %v2361_v45 = vor.u32 %v2840_v38, %v2358_v42  ;;  %v2518_v38 = vld [vmem:[#allocation9 + $0xe8] sm:$0xf0]  ;;  %v2508_v42 = vld [vmem:[#allocation9 + $0xd0] sm:$0xf] }
  0xc5   :  { %v2350_v52 = vld [vmem:[#allocation7 + $0x98] sm:$0xf0]  ;;  %v2521_v41 = vor.u32 %v2880_v35, %v2518_v38 }
  0xc6   :  { %v805_v58 = vadd.f32 %v804_v50, %v792_v30  ;;  %1186 = vmatpush.bf16.msra.mxu2 %v2361_v45  ;;  %v2349_v50 = vor.u32 %v2839_v47, %v2348_v46  ;;  %v2353_v53 = vor.u32 %v2838_v48, %v2350_v52  ;;  %v2862_v45 = vld [vmem:[#allocation9 + $0x54] sm:$0xf]  ;;  %v2446_v47 = vld [vmem:[#allocation9 + $0x58] sm:$0xf0] }
  0xc7   :  { %v780_v55 = vpop.f32.mrf.mxu1  ;;  %v2878_v48 = vld [vmem:[#allocation9 + $0xd4] sm:$0xf]  ;;  %v2478_v38 = vld [vmem:[#allocation9 + $0x98] sm:$0xf0] }
  0xc8   :  { %1161 = vmatpush.bf16.msrb.mxu3 %v2349_v50  ;;  %v2340_v55 = vld [vmem:[#allocation7 + $0x80] sm:$0xf]  ;;  %v2510_v50 = vld [vmem:[#allocation9 + $0xd8] sm:$0xf0] }
  0xc9   :  { %v2341_v60 = vor.u32 %v2837_v56, %v2340_v55  ;;  %v2861_v55 = vld [vmem:[#allocation9 + $0x44] sm:$0xf0]  ;;  %v2500_v56 = vld [vmem:[#allocation9 + $0xc0] sm:$0xf] }
  0xca   :  { %1187 = vmatpush.bf16.msra.mxu2 %v2353_v53  ;;  %v2449_v53 = vor.u32 %v2862_v45, %v2446_v47  ;;  %v2869_v45 = vld [vmem:[#allocation9 + $0x84] sm:$0xf0]  ;;  %v2406_v47 = vld [vmem:[#allocation9 + $0x8] sm:$0xf0] }
  0xcb   :  { %v793_v62 = vpop.f32.mrf.mxu2 }
  0xcc   :  { %v806_v7 = vpop.f32.mrf.mxu3  ;;  %v2345_v62 = vor.u32 %v2836_v57, %v2342_v61  ;;  %1162 = vmatpush.bf16.msrb.mxu3 %v2341_v60  ;;  %v2513_v57 = vor.u32 %v2878_v48, %v2510_v50  ;;  %v2860_v60 = vld [vmem:[#allocation9 + $0x44] sm:$0xf]  ;;  %v2438_v61 = vld [vmem:[#allocation9 + $0x48] sm:$0xf0] }
  0xce   :  { %1188 = vmatpush.bf16.msra.mxu2 %v2345_v62  ;;  %v2876_v62 = vld [vmem:[#allocation9 + $0xc4] sm:$0xf] }
  0xd3   :  { %v843_v9 = vpop.f32.mrf.mxu2 }
  0xdb   :  { %v845_v14 = vpop.f32.mrf.mxu2 }
  0xdc   :  { %v817_v12 = vpop.f32.mrf.mxu0  ;;  %v2460_v14 = vld [vmem:[#allocation9 + $0x70] sm:$0xf] }
  0xdd   :  { %v818_v13 = vadd.f32 %v817_v12, %v805_v58  ;;  %v2461_v17 = vor.u32 %v2867_v15, %v2460_v14  ;;  %v2856_v14 = vld [vmem:[#allocation9 + $0x24] sm:$0xf]  ;;  %v2422_v15 = vld [vmem:[#allocation9 + $0x28] sm:$0xf0] }
  0xde   :  { %v2425_v20 = vor.u32 %v2856_v14, %v2422_v15  ;;  %v2894_v14 = vld [vmem:[#allocation10 + $0x54] sm:$0xf] }
  0xdf   :  { %v830_v18 = vpop.f32.mrf.mxu1  ;;  %1398 = vmatpush.bf16.msra.mxu1 %v2461_v17  ;;  %v2486_v17 = vld [vmem:[#allocation9 + $0xa8] sm:$0xf0] }
  0xe0   :  { %v831_v21 = vadd.f32 %v830_v18, %v818_v13  ;;  %v2883_v18 = vld [vmem:[#allocation9 + $0xf4] sm:$0xf0] }
  0xe2   :  { %v844_v23 = vadd.f32 %v843_v9, %v831_v21  ;;  %v2525_v21 = vor.u32 %v2883_v18, %v2524_v16  ;;  %v2872_v16 = vld [vmem:[#allocation9 + $0xa4] sm:$0xf] }
  0xe3   :  { %1399 = vmatpush.bf16.msra.mxu1 %v2453_v31  ;;  %v2871_v31 = vld [vmem:[#allocation9 + $0x94] sm:$0xf0] }
  0xe4   :  { %v938_v29 = vmul.f32 0.01, %v844_v23  ;;  %v819_v32 = vpop.f32.mrf.mxu0  ;;  %v856_v39 = vpop.f32.mrf.mxu3  ;;  %1411 = vmatpush.bf16.msra.mxu3 %v2525_v21  ;;  %v2489_v21 = vor.u32 %v2872_v16, %v2486_v17  ;;  %v2574_v16 = vld [vmem:[#allocation10 + $0x58] sm:$0xf0]  ;;  %v2910_v17 = vld [vmem:[#allocation10 + $0xd4] sm:$0xf] }
  0xe5   :  { %v857_v0 = vadd.f32 %v856_v39, %v259_v63  ;;  %v2444_v39 = vld [vmem:[#allocation9 + $0x50] sm:$0xf]  ;;  %v2502_v63 = vld [vmem:[#allocation9 + $0xc8] sm:$0xf0] }
  0xe6   :  { %v940_v33 = vmax.f32 %v844_v23, %v938_v29  ;;  %v2882_v23 = vld [vmem:[#allocation9 + $0xf4] sm:$0xf]  ;;  %v2881_v29 = vld [vmem:[#allocation9 + $0xe4] sm:$0xf0] }
  0xe7   :  { %v869_v34 = vpop.f32.mrf.mxu2  ;;  %v832_v40 = vpop.f32.mrf.mxu1  ;;  %v2529_v26 = vor.u32 %v2882_v23, %v2526_v24  ;;  %v2517_v32 = vor.u32 %v2881_v29, %v2516_v28  ;;  %v2476_v28 = vld [vmem:[#allocation9 + $0x90] sm:$0xf] }
  0xe8   :  { %v942_v44 = vpack.c.bf16 %v940_v33, %v940_v33  ;;  %v870_v2 = vadd.f32 %v869_v34, %v857_v0  ;;  %v2864_v33 = vld [vmem:[#allocation9 + $0x64] sm:$0xf]  ;;  %v2454_v34 = vld [vmem:[#allocation9 + $0x68] sm:$0xf0]  ;;  %v2863_v40 = vld [vmem:[#allocation9 + $0x54] sm:$0xf0] }
  0xe9   :  { %1437 = vmatpush.bf16.msrb.mxu2 %v2529_v26  ;;  %v2457_v36 = vor.u32 %v2864_v33, %v2454_v34  ;;  %v2445_v46 = vor.u32 %v2863_v40, %v2444_v39  ;;  %1412 = vmatpush.bf16.msra.mxu3 %v2517_v32  ;;  %v2412_v26 = vld [vmem:[#allocation9 + $0x10] sm:$0xf]  ;;  %v2854_v32 = vld [vmem:[#allocation9 + $0x14] sm:$0xf]  ;;  %v2414_v33 = vld [vmem:[#allocation9 + $0x18] sm:$0xf0]  ;;  %v2477_v34 = vor.u32 %v2871_v31, %v2476_v28 }
  0xea   :  { %1150 = vmatmul.bf16.vlgmr.msrb.gmra.mxu1 %v942_v44  ;;  %1176 = vmatmul.bf16.vlgmr.msra.gmra.mxu0 %v942_v44  ;;  %v2879_v44 = vld [vmem:[#allocation9 + $0xd4] sm:$0xf0]  ;;  %v2413_v29 = vor.u32 %v2855_v27, %v2412_v26  ;;  %v2417_v35 = vor.u32 %v2854_v32, %v2414_v33  ;;  %v2404_v40 = vld [vmem:[#allocation9] sm:$0xf]  ;;  %v2909_v27 = vld [vmem:[#allocation10 + $0xc4] sm:$0xf0] }
  0xeb   :  { %1425 = vmatpush.bf16.msrb.mxu0 %v2457_v36  ;;  %v2509_v52 = vor.u32 %v2879_v44, %v2508_v42  ;;  %1400 = vmatpush.bf16.msra.mxu1 %v2445_v46  ;;  %v2870_v36 = vld [vmem:[#allocation9 + $0x94] sm:$0xf]  ;;  %v2468_v42 = vld [vmem:[#allocation9 + $0x80] sm:$0xf]  ;;  %v2852_v46 = vld [vmem:[#allocation9 + $0x4] sm:$0xf] }
  0xec   :  { %v858_v59 = vpop.f32.mrf.mxu3  ;;  %v2481_v39 = vor.u32 %v2870_v36, %v2478_v38  ;;  %v2469_v48 = vor.u32 %v2869_v45, %v2468_v42  ;;  %v2409_v50 = vor.u32 %v2852_v46, %v2406_v47  ;;  %v2892_v28 = vld [vmem:[#allocation10 + $0x44] sm:$0xf]  ;;  %v2630_v32 = vld [vmem:[#allocation10 + $0xc8] sm:$0xf0]  ;;  %v976_v38 = vld [vmem:[%s3283_s4] sm:$0x3] }
  0xed   :  { %1438 = vmatpush.bf16.msrb.mxu2 %v2521_v41  ;;  %v2877_v59 = vld [vmem:[#allocation9 + $0xc4] sm:$0xf0]  ;;  %1413 = vmatpush.bf16.msra.mxu3 %v2509_v52  ;;  %v2868_v52 = vld [vmem:[#allocation9 + $0x84] sm:$0xf] }
  0xee   :  { %v2853_v41 = vld [vmem:[#allocation9 + $0x4] sm:$0xf0]  ;;  %v2908_v31 = vld [vmem:[#allocation10 + $0xc4] sm:$0xf] }
  0xef   :  { %v871_v54 = vpop.f32.mrf.mxu2  ;;  %1426 = vmatpush.bf16.msrb.mxu0 %v2449_v53  ;;  %v2405_v44 = vor.u32 %v2853_v41, %v2404_v40  ;;  %v2470_v53 = vld [vmem:[#allocation9 + $0x88] sm:$0xf0]  ;;  %v2633_v36 = vor.u32 %v2908_v31, %v2630_v32  ;;  %v979_v40 = vperm.slane %v976_v38, 1  ;;  %v2884_v31 = vld [vmem:[#allocation10 + $0x4] sm:$0xf] }
  0xf0   :  { %v2436_v54 = vld [vmem:[#allocation9 + $0x40] sm:$0xf]  ;;  %v2534_v32 = vld [vmem:[#allocation10 + $0x8] sm:$0xf0] }
  0xf1   :  { %v2437_v0 = vor.u32 %v2861_v55, %v2436_v54  ;;  %1439 = vmatpush.bf16.msrb.mxu2 %v2513_v57  ;;  %v2473_v54 = vor.u32 %v2868_v52, %v2470_v53  ;;  %v2588_v55 = vld [vmem:[#allocation10 + $0x70] sm:$0xf] }
  0xf2   :  { %v2652_v57 = vld [vmem:[#allocation10 + $0xf0] sm:$0xf] }
  0xf3   :  { %1401 = vmatpush.bf16.msra.mxu1 %v2437_v0 }
  0xfc   :  { %v882_v1 = vpop.f32.mrf.mxu0 }
  0xfd   :  { %v883_v6 = vadd.f32 %v882_v1, %v870_v2  ;;  %v2501_v1 = vor.u32 %v2877_v59, %v2500_v56  ;;  %v2441_v2 = vor.u32 %v2860_v60, %v2438_v61  ;;  %v2899_v56 = vld [vmem:[#allocation10 + $0x74] sm:$0xf0]  ;;  %v2898_v61 = vld [vmem:[#allocation10 + $0x74] sm:$0xf] }
  0xfe   :  { %v2589_v59 = vor.u32 %v2899_v56, %v2588_v55  ;;  %v2915_v60 = vld [vmem:[#allocation10 + $0xf4] sm:$0xf0] }
  0xff   :  { %v895_v5 = vpop.f32.mrf.mxu1  ;;  %1414 = vmatpush.bf16.msra.mxu3 %v2501_v1  ;;  %1427 = vmatpush.bf16.msrb.mxu0 %v2441_v2  ;;  %v2914_v1 = vld [vmem:[#allocation10 + $0xf4] sm:$0xf]  ;;  %v2654_v2 = vld [vmem:[#allocation10 + $0xf8] sm:$0xf0] }
 0x100   :  { %v896_v51 = vadd.f32 %v895_v5, %v883_v6  ;;  %v2428_v5 = vld [vmem:[#allocation9 + $0x30] sm:$0xf]  ;;  %v2859_v6 = vld [vmem:[#allocation9 + $0x34] sm:$0xf0] }
 0x104   :  { %v908_v7 = vpop.f32.mrf.mxu3  ;;  %v884_v8 = vpop.f32.mrf.mxu0 }
 0x105   :  { %v909_v30 = vadd.f32 %v908_v7, %v896_v51  ;;  %v2492_v7 = vld [vmem:[#allocation9 + $0xb0] sm:$0xf]  ;;  %v2505_v8 = vor.u32 %v2876_v62, %v2502_v63  ;;  %v2875_v51 = vld [vmem:[#allocation9 + $0xb4] sm:$0xf0]  ;;  %v2590_v62 = vld [vmem:[#allocation10 + $0x78] sm:$0xf0]  ;;  %v2653_v63 = vor.u32 %v2915_v60, %v2652_v57 }
 0x106   :  { %v2593_v0 = vor.u32 %v2898_v61, %v2590_v62  ;;  %v2620_v60 = vld [vmem:[#allocation10 + $0xb0] sm:$0xf]  ;;  %v2907_v61 = vld [vmem:[#allocation10 + $0xb4] sm:$0xf0]  ;;  %v2890_v62 = vld [vmem:[#allocation10 + $0x34] sm:$0xf] }
 0x107   :  { %v921_v9 = vpop.f32.mrf.mxu2  ;;  %v897_v10 = vpop.f32.mrf.mxu1  ;;  %1440 = vmatpush.bf16.msrb.mxu2 %v2505_v8  ;;  %v2644_v8 = vld [vmem:[#allocation10 + $0xe0] sm:$0xf] }
 0x108   :  { %v922_v4 = vadd.f32 %v921_v9, %v909_v30  ;;  %v2858_v9 = vld [vmem:[#allocation9 + $0x34] sm:$0xf]  ;;  %v2430_v30 = vld [vmem:[#allocation9 + $0x38] sm:$0xf0] }
 0x109   :  { %v2874_v10 = vld [vmem:[#allocation9 + $0xb4] sm:$0xf] }
 0x10c   :  { %v910_v3 = vpop.f32.mrf.mxu3  ;;  %v934_v11 = vpop.f32.mrf.mxu0 }
 0x10d   :  { %v935_v37 = vadd.f32 %v934_v11, %v922_v4  ;;  %v2494_v4 = vld [vmem:[#allocation9 + $0xb8] sm:$0xf0]  ;;  %v2429_v3 = vor.u32 %v2859_v6, %v2428_v5  ;;  %v2493_v11 = vor.u32 %v2875_v51, %v2492_v7  ;;  %v2580_v5 = vld [vmem:[#allocation10 + $0x60] sm:$0xf]  ;;  %v2657_v6 = vor.u32 %v2914_v1, %v2654_v2  ;;  %v2897_v7 = vld [vmem:[#allocation10 + $0x64] sm:$0xf0] }
 0x10e   :  { %v2913_v51 = vld [vmem:[#allocation10 + $0xe4] sm:$0xf0]  ;;  %v2906_v2 = vld [vmem:[#allocation10 + $0xb4] sm:$0xf] }
 0x10f   :  { %v923_v58 = vpop.f32.mrf.mxu2  ;;  %v939_v43 = vmul.f32 0.01, %v935_v37  ;;  %1402 = vmatpush.bf16.msra.mxu1 %v2429_v3  ;;  %1415 = vmatpush.bf16.msra.mxu3 %v2493_v11  ;;  %v2912_v3 = vld [vmem:[#allocation10 + $0xe4] sm:$0xf] }
 0x110   :  { %v2420_v58 = vld [vmem:[#allocation9 + $0x20] sm:$0xf] }
 0x111   :  { %v941_v12 = vmax.f32 %v935_v37, %v939_v43  ;;  %v2433_v37 = vor.u32 %v2858_v9, %v2430_v30  ;;  %v2857_v43 = vld [vmem:[#allocation9 + $0x24] sm:$0xf0]  ;;  %v2581_v9 = vor.u32 %v2897_v7, %v2580_v5  ;;  %v2645_v30 = vor.u32 %v2913_v51, %v2644_v8  ;;  %v2622_v5 = vld [vmem:[#allocation10 + $0xb8] sm:$0xf0]  ;;  %v2548_v7 = vld [vmem:[#allocation10 + $0x20] sm:$0xf] }
 0x112   :  { %v2421_v18 = vor.u32 %v2857_v43, %v2420_v58  ;;  %v2572_v58 = vld [vmem:[#allocation10 + $0x50] sm:$0xf]  ;;  %v2895_v43 = vld [vmem:[#allocation10 + $0x54] sm:$0xf0]  ;;  %v2889_v8 = vld [vmem:[#allocation10 + $0x24] sm:$0xf0] }
 0x113   :  { %v943_v49 = vpack.c.bf16 %v941_v12, %v941_v12  ;;  %v2484_v12 = vld [vmem:[#allocation9 + $0xa0] sm:$0xf]  ;;  %1428 = vmatpush.bf16.msrb.mxu0 %v2433_v37  ;;  %v2646_v37 = vld [vmem:[#allocation10 + $0xe8] sm:$0xf0]  ;;  %v2573_v15 = vor.u32 %v2895_v43, %v2572_v58 }
 0x114   :  { %v936_v13 = vpop.f32.mrf.mxu0  ;;  %1403 = vmatpush.bf16.msra.mxu1 %v2421_v18  ;;  %v2638_v18 = vld [vmem:[#allocation10 + $0xd8] sm:$0xf0]  ;;  %v2612_v51 = vld [vmem:[#allocation10 + $0xa0] sm:$0xf]  ;;  %v2614_v58 = vld [vmem:[#allocation10 + $0xa8] sm:$0xf0] }
 0x115   :  { %1163 = vmatmul.bf16.vlgmr.msrb.gmra.mxu3 %v943_v49  ;;  %1189 = vmatmul.bf16.vlgmr.msra.gmra.mxu2 %v943_v49  ;;  %v2497_v49 = vor.u32 %v2874_v10, %v2494_v4  ;;  %v2873_v13 = vld [vmem:[#allocation9 + $0xa4] sm:$0xf0]  ;;  %v2896_v10 = vld [vmem:[#allocation10 + $0x64] sm:$0xf]  ;;  %v2582_v4 = vld [vmem:[#allocation10 + $0x68] sm:$0xf0]  ;;  %v2641_v26 = vor.u32 %v2910_v17, %v2638_v18 }
 0x116   :  { %v2485_v19 = vor.u32 %v2873_v13, %v2484_v12  ;;  %v2585_v11 = vor.u32 %v2896_v10, %v2582_v4  ;;  %v2649_v12 = vor.u32 %v2912_v3, %v2646_v37  ;;  %v2911_v13 = vld [vmem:[#allocation10 + $0xd4] sm:$0xf0]  ;;  %v2888_v10 = vld [vmem:[#allocation10 + $0x24] sm:$0xf]  ;;  %v2550_v4 = vld [vmem:[#allocation10 + $0x28] sm:$0xf0] }
 0x117   :  { %1441 = vmatpush.bf16.msrb.mxu2 %v2497_v49  ;;  %1429 = vmatpush.bf16.msrb.mxu0 %v2425_v20  ;;  %v2636_v49 = vld [vmem:[#allocation10 + $0xd0] sm:$0xf]  ;;  %v2577_v20 = vor.u32 %v2894_v14, %v2574_v16  ;;  %v2904_v37 = vld [vmem:[#allocation10 + $0xa4] sm:$0xf]  ;;  %v2886_v16 = vld [vmem:[#allocation10 + $0x14] sm:$0xf] }
 0x118   :  { %1416 = vmatpush.bf16.msra.mxu3 %v2485_v19  ;;  %1404 = vmatpush.bf16.msra.mxu1 %v2413_v29  ;;  %v2637_v19 = vor.u32 %v2911_v13, %v2636_v49  ;;  %v2566_v29 = vld [vmem:[#allocation10 + $0x48] sm:$0xf0]  ;;  %v2617_v43 = vor.u32 %v2904_v37, %v2614_v58  ;;  %v2887_v49 = vld [vmem:[#allocation10 + $0x14] sm:$0xf0]  ;;  %v2604_v13 = vld [vmem:[#allocation10 + $0x90] sm:$0xf] }
 0x119   :  { %v2542_v17 = vld [vmem:[#allocation10 + $0x18] sm:$0xf0]  ;;  %v1488_v37 = vld [vmem:[%s3287_s8] sm:$0x3] }
 0x11b   :  { %1442 = vmatpush.bf16.msrb.mxu2 %v2489_v21  ;;  %1430 = vmatpush.bf16.msrb.mxu0 %v2417_v35  ;;  %v2564_v21 = vld [vmem:[#allocation10 + $0x40] sm:$0xf]  ;;  %v2569_v35 = vor.u32 %v2892_v28, %v2566_v29  ;;  %v2901_v29 = vld [vmem:[#allocation10 + $0x84] sm:$0xf0] }
 0x11c   :  { %1417 = vmatpush.bf16.msra.mxu3 %v2477_v34  ;;  %1405 = vmatpush.bf16.msra.mxu1 %v2405_v44 }
 0x11f   :  { %1443 = vmatpush.bf16.msrb.mxu2 %v2481_v39  ;;  %1431 = vmatpush.bf16.msrb.mxu0 %v2409_v50  ;;  %v978_v39 = vperm.slane %v976_v38, 0 }
 0x120   :  { %1418 = vmatpush.bf16.msra.mxu3 %v2469_v48  ;;  %1654 = vmatpush.bf16.msrb.mxu1 %v2589_v59  ;;  %v2556_v59 = vld [vmem:[#allocation10 + $0x30] sm:$0xf] }
 0x123   :  { %1444 = vmatpush.bf16.msrb.mxu2 %v2473_v54  ;;  %1680 = vmatpush.bf16.msra.mxu0 %v2593_v0  ;;  %v2621_v0 = vor.u32 %v2907_v61, %v2620_v60 }
 0x124   :  { %1667 = vmatpush.bf16.msrb.mxu3 %v2653_v63  ;;  %1655 = vmatpush.bf16.msrb.mxu1 %v2581_v9  ;;  %v2558_v63 = vld [vmem:[#allocation10 + $0x38] sm:$0xf0]  ;;  %v2549_v9 = vor.u32 %v2889_v8, %v2548_v7 }
 0x125   :  { %v2561_v1 = vor.u32 %v2890_v62, %v2558_v63  ;;  %v2919_v8 = vld [vmem:[#allocation12 + $0x18] sm:$0xff] }
 0x127   :  { %1693 = vmatpush.bf16.msra.mxu2 %v2657_v6  ;;  %1681 = vmatpush.bf16.msra.mxu0 %v2585_v11  ;;  %v2625_v6 = vor.u32 %v2906_v2, %v2622_v5  ;;  %v2553_v11 = vor.u32 %v2888_v10, %v2550_v4  ;;  %v2917_v10 = vld [vmem:[#allocation12 + $0x8] sm:$0xff] }
 0x128   :  { %1668 = vmatpush.bf16.msrb.mxu3 %v2645_v30  ;;  %1656 = vmatpush.bf16.msrb.mxu1 %v2573_v15  ;;  %v2905_v30 = vld [vmem:[#allocation10 + $0xa4] sm:$0xf0]  ;;  %v2903_v15 = vld [vmem:[#allocation10 + $0x94] sm:$0xf0] }
 0x129   :  { %v2613_v3 = vor.u32 %v2905_v30, %v2612_v51  ;;  %v2605_v18 = vor.u32 %v2903_v15, %v2604_v13  ;;  %v2927_v51 = vld [vmem:[#allocation12 + $0x58] sm:$0xff]  ;;  %v2926_v30 = vld [vmem:[#allocation12 + $0x50] sm:$0xff]  ;;  %v2925_v4 = vld [vmem:[#allocation12 + $0x48] sm:$0xff] }
 0x12b   :  { %1694 = vmatpush.bf16.msra.mxu2 %v2649_v12  ;;  %1682 = vmatpush.bf16.msra.mxu0 %v2577_v20  ;;  %v2540_v12 = vld [vmem:[#allocation10 + $0x10] sm:$0xf]  ;;  %v2902_v20 = vld [vmem:[#allocation10 + $0x94] sm:$0xf] }
 0x12c   :  { %1669 = vmatpush.bf16.msrb.mxu3 %v2637_v19  ;;  %v2541_v14 = vor.u32 %v2887_v49, %v2540_v12  ;;  %v2545_v19 = vor.u32 %v2886_v16, %v2542_v17  ;;  %v1490_v12 = vperm.slane %v1488_v37, 0  ;;  %v1491_v49 = vperm.slane %v1488_v37, 1 }
 0x12f   :  { %1695 = vmatpush.bf16.msra.mxu2 %v2641_v26  ;;  %1683 = vmatpush.bf16.msra.mxu0 %v2569_v35  ;;  %v2885_v26 = vld [vmem:[#allocation10 + $0x4] sm:$0xf0]  ;;  %v2900_v35 = vld [vmem:[#allocation10 + $0x84] sm:$0xf] }
 0x133   :  { %1696 = vmatpush.bf16.msra.mxu2 %v2633_v36  ;;  %1684 = vmatpush.bf16.msra.mxu0 %v2561_v1  ;;  %v2598_v36 = vld [vmem:[#allocation10 + $0x88] sm:$0xf0] }
 0x134   :  { %v2601_v38 = vor.u32 %v2900_v35, %v2598_v36 }
 0x137   :  { %1697 = vmatpush.bf16.msra.mxu2 %v2625_v6  ;;  %1685 = vmatpush.bf16.msra.mxu0 %v2553_v11  ;;  %v2924_v11 = vld [vmem:[#allocation12 + $0x40] sm:$0xff] }
 0x13b   :  { %1698 = vmatpush.bf16.msra.mxu2 %v2617_v43  ;;  %1686 = vmatpush.bf16.msra.mxu0 %v2545_v19 }
 0x167   :  { %v3258_v22 = vpop.f32.mrf.mxu1  ;;  %v3260_v23 = vpop.f32.mrf.mxu0 }
 0x168   :  { %v1152_v41 = vadd.f32 %v3258_v22, %v978_v39  ;;  %v1178_v42 = vadd.f32 %v3260_v23, %v979_v40  ;;  %v2891_v22 = vld [vmem:[#allocation10 + $0x34] sm:$0xf0] }
 0x169   :  { %v2557_v23 = vor.u32 %v2891_v22, %v2556_v59  ;;  %v2923_v39 = vld [vmem:[#allocation12 + $0x38] sm:$0xff] }
 0x16a   :  { %v2931_v40 = vld [vmem:[#allocation12 + $0x78] sm:$0xff] }
 0x16f   :  { %v1153_v24 = vpop.f32.mrf.mxu1  ;;  %v1179_v25 = vpop.f32.mrf.mxu0 }
 0x170   :  { %v2893_v24 = vld [vmem:[#allocation10 + $0x44] sm:$0xf0]  ;;  %v2628_v25 = vld [vmem:[#allocation10 + $0xc0] sm:$0xf] }
 0x171   :  { %v2565_v33 = vor.u32 %v2893_v24, %v2564_v21  ;;  %v2629_v34 = vor.u32 %v2909_v27, %v2628_v25  ;;  %v2606_v21 = vld [vmem:[#allocation10 + $0x98] sm:$0xf0]  ;;  %v2532_v25 = vld [vmem:[#allocation10] sm:$0xf] }
 0x172   :  { %v2609_v24 = vor.u32 %v2902_v20, %v2606_v21  ;;  %v2596_v27 = vld [vmem:[#allocation10 + $0x80] sm:$0xf]  ;;  %v2533_v28 = vor.u32 %v2885_v26, %v2532_v25 }
 0x173   :  { %1657 = vmatpush.bf16.msrb.mxu1 %v2565_v33  ;;  %1670 = vmatpush.bf16.msrb.mxu3 %v2629_v34  ;;  %v2597_v33 = vor.u32 %v2901_v29, %v2596_v27  ;;  %v2537_v34 = vor.u32 %v2884_v31, %v2534_v32 }
 0x174   :  { %1699 = vmatpush.bf16.msra.mxu2 %v2609_v24 }
 0x175   :  { %1687 = vmatpush.bf16.msra.mxu0 %v2537_v34 }
 0x177   :  { %1658 = vmatpush.bf16.msrb.mxu1 %v2557_v23  ;;  %1671 = vmatpush.bf16.msrb.mxu3 %v2621_v0 }
 0x178   :  { %1700 = vmatpush.bf16.msra.mxu2 %v2601_v38 }
 0x17b   :  { %1659 = vmatpush.bf16.msrb.mxu1 %v2549_v9  ;;  %1672 = vmatpush.bf16.msrb.mxu3 %v2613_v3  ;;  %v2918_v9 = vld [vmem:[#allocation12 + $0x10] sm:$0xff]  ;;  %v2916_v3 = vld [vmem:[#allocation12] sm:$0xff] }
 0x17f   :  { %1660 = vmatpush.bf16.msrb.mxu1 %v2541_v14  ;;  %1673 = vmatpush.bf16.msrb.mxu3 %v2605_v18 }
 0x183   :  { %1661 = vmatpush.bf16.msrb.mxu1 %v2533_v28  ;;  %1674 = vmatpush.bf16.msrb.mxu3 %v2597_v33  ;;  %v2943_v33 = vld [vmem:[%s3289_s10] ss:$0 sm:$0xff] }
 0x198   :  { %v1164_v44 = vpop.f32.mrf.mxu3  ;;  %v1190_v45 = vpop.f32.mrf.mxu2 }
 0x199   :  { %v1165_v46 = vadd.f32 %v1164_v44, %v1152_v41  ;;  %v1191_v47 = vadd.f32 %v1190_v45, %v1178_v42  ;;  %v2922_v41 = vld [vmem:[#allocation12 + $0x30] sm:$0xff]  ;;  %v2921_v44 = vld [vmem:[#allocation12 + $0x28] sm:$0xff] }
 0x19a   :  { %v2930_v42 = vld [vmem:[#allocation12 + $0x70] sm:$0xff]  ;;  %v2929_v45 = vld [vmem:[#allocation12 + $0x68] sm:$0xff] }
 0x19b   :  { %v1194_v48 = vmul.f32 0.01, %v1165_v46  ;;  %v1195_v50 = vmul.f32 0.01, %v1191_v47 }
 0x19d   :  { %v1196_v52 = vmax.f32 %v1165_v46, %v1194_v48  ;;  %v1197_v53 = vmax.f32 %v1191_v47, %v1195_v50  ;;  %v2920_v46 = vld [vmem:[#allocation12 + $0x20] sm:$0xff]  ;;  %v1232_v48 = vld [vmem:[%s3285_s6] sm:$0x3] }
 0x19e   :  { %v2928_v47 = vld [vmem:[#allocation12 + $0x60] sm:$0xff] }
 0x19f   :  { %v1198_v54 = vpack.c.bf16 %v1196_v52, %v1196_v52  ;;  %v1199_v55 = vpack.c.bf16 %v1197_v53, %v1197_v53  ;;  %v1234_v52 = vperm.slane %v1232_v48, 0 }
 0x1a0   :  { %v1166_v56 = vpop.f32.mrf.mxu3  ;;  %v1192_v57 = vpop.f32.mrf.mxu2 }
 0x1a1   :  { %1406 = vmatmul.bf16.vlgmr.msra.gmra.mxu1 %v1198_v54  ;;  %1419 = vmatmul.bf16.vlgmr.msra.gmra.mxu3 %v1199_v55 }
 0x1a2   :  { %1432 = vmatmul.bf16.vlgmr.msrb.gmra.mxu0 %v1198_v54  ;;  %1445 = vmatmul.bf16.vlgmr.msrb.gmra.mxu2 %v1199_v55  ;;  %v1235_v54 = vperm.slane %v1232_v48, 1 }
 0x1a3   :  { %1844 = vmatpush.bf16.msra.mxu1 %v2923_v39  ;;  %1857 = vmatpush.bf16.msra.mxu3 %v2931_v40 }
 0x1a7   :  { %1845 = vmatpush.bf16.msra.mxu1 %v2922_v41  ;;  %1858 = vmatpush.bf16.msra.mxu3 %v2930_v42 }
 0x1ab   :  { %1846 = vmatpush.bf16.msra.mxu1 %v2921_v44  ;;  %1859 = vmatpush.bf16.msra.mxu3 %v2929_v45 }
 0x1af   :  { %1847 = vmatpush.bf16.msra.mxu1 %v2920_v46  ;;  %1860 = vmatpush.bf16.msra.mxu3 %v2928_v47 }
 0x1b3   :  { %1848 = vmatpush.bf16.msra.mxu1 %v2919_v8  ;;  %1861 = vmatpush.bf16.msra.mxu3 %v2927_v51 }
 0x1b7   :  { %1849 = vmatpush.bf16.msra.mxu1 %v2918_v9  ;;  %1862 = vmatpush.bf16.msra.mxu3 %v2926_v30 }
 0x1bb   :  { %1850 = vmatpush.bf16.msra.mxu1 %v2917_v10  ;;  %1863 = vmatpush.bf16.msra.mxu3 %v2925_v4 }
 0x1bf   :  { %1851 = vmatpush.bf16.msra.mxu1 %v2916_v3  ;;  %1864 = vmatpush.bf16.msra.mxu3 %v2924_v11 }
 0x21e   :  { %v1407_v50 = vpop.f32.mrf.mxu1 }
 0x21f   :  { %v1433_v53 = vpop.f32.mrf.mxu0  ;;  %v1408_v55 = vadd.f32 %v1407_v50, %v1234_v52 }
 0x220   :  { %v1434_v56 = vadd.f32 %v1433_v53, %v1235_v54 }
 0x224   :  { %v1420_v57 = vpop.f32.mrf.mxu3 }
 0x225   :  { %v1421_v59 = vadd.f32 %v1420_v57, %v1408_v55  ;;  %v1446_v22 = vpop.f32.mrf.mxu2 }
 0x226   :  { %v1447_v60 = vadd.f32 %v1446_v22, %v1434_v56  ;;  %v1409_v23 = vpop.f32.mrf.mxu1 }
 0x227   :  { %v1450_v61 = vmul.f32 0.01, %v1421_v59  ;;  %v1435_v62 = vpop.f32.mrf.mxu0 }
 0x228   :  { %v1451_v63 = vmul.f32 0.01, %v1447_v60 }
 0x229   :  { %v1452_v0 = vmax.f32 %v1421_v59, %v1450_v61 }
 0x22a   :  { %v1453_v1 = vmax.f32 %v1447_v60, %v1451_v63 }
 0x22b   :  { %v1454_v2 = vpack.c.bf16 %v1452_v0, %v1452_v0 }
 0x22c   :  { %v1455_v5 = vpack.c.bf16 %v1453_v1, %v1453_v1  ;;  %v1422_v6 = vpop.f32.mrf.mxu3 }
 0x22d   :  { %v1448_v7 = vpop.f32.mrf.mxu2  ;;  %1662 = vmatmul.bf16.vlgmr.msrb.gmra.mxu1 %v1454_v2  ;;  %1688 = vmatmul.bf16.vlgmr.msra.gmra.mxu0 %v1454_v2 }
 0x22e   :  { %1675 = vmatmul.bf16.vlgmr.msrb.gmra.mxu3 %v1455_v5  ;;  %1701 = vmatmul.bf16.vlgmr.msra.gmra.mxu2 %v1455_v5 }
 0x2aa   :  { %v1663_v58 = vpop.f32.mrf.mxu1  ;;  %v1689_v43 = vpop.f32.mrf.mxu0 }
 0x2ab   :  { %v1664_v13 = vadd.f32 %v1663_v58, %v1490_v12  ;;  %v1690_v14 = vadd.f32 %v1689_v43, %v1491_v49 }
 0x2b1   :  { %v1676_v15 = vpop.f32.mrf.mxu3  ;;  %v1702_v16 = vpop.f32.mrf.mxu2 }
 0x2b2   :  { %v1677_v17 = vadd.f32 %v1676_v15, %v1664_v13  ;;  %v1703_v18 = vadd.f32 %v1702_v16, %v1690_v14  ;;  %v1665_v19 = vpop.f32.mrf.mxu1  ;;  %v1691_v20 = vpop.f32.mrf.mxu0 }
 0x2b4   :  { %v1706_v21 = vmul.f32 0.01, %v1677_v17  ;;  %v1707_v24 = vmul.f32 0.01, %v1703_v18 }
 0x2b6   :  { %v1708_v25 = vmax.f32 %v1677_v17, %v1706_v21  ;;  %v1709_v26 = vmax.f32 %v1703_v18, %v1707_v24 }
 0x2b8   :  { %v1710_v27 = vpack.c.bf16 %v1708_v25, %v1708_v25  ;;  %v1711_v28 = vpack.c.bf16 %v1709_v26, %v1709_v26 }
 0x2b9   :  { %v1678_v29 = vpop.f32.mrf.mxu3  ;;  %v1704_v31 = vpop.f32.mrf.mxu2 }
 0x2ba   :  { %1852 = vmatmul.bf16.vlgmr.msra.gmra.mxu1 %v1710_v27  ;;  %1865 = vmatmul.bf16.vlgmr.msra.gmra.mxu3 %v1711_v28 }
 0x337   :  { %v1853_v32 = vpop.f32.mrf.mxu1 }
 0x338   :  { %v1854_v34 = vadd.f32 %v2943_v33, %v1853_v32 }
 0x33d   :  { %v1866_v35 = vpop.f32.mrf.mxu3 }
 0x33e   :  { %v1867_v36 = vadd.f32 %v1866_v35, %v1854_v34 }
 0x33f   :  { %v1855_v38 = vpop.f32.mrf.mxu1 }
 0x340   :  { %v1870_v39 = vpack.c.bf16 %v1867_v36, %v1867_v36 }
 0x342   :  { %1871 = vst [vmem:[%s3290_s11] sm:$0xf] %v1870_v39 }
 0x345   :  { %v1868_v40 = vpop.f32.mrf.mxu3 }
 0x346   :  { %1876 = vsyncpa [#allocation3], 1 }
 0x347   :  { %1877 = vsyncpa [#allocation5], 1 }
 0x348   :  { %1878 = vsyncpa [#allocation8], 1 }
 0x349   :  { %1879 = vsyncpa [#allocation11], 1 }

</bundles_post_ra>
